<compile_context>
chip_gen: v6e
topology: v6e:2x2x1
jax: 0.10.0
libtpu: 0.0.40
codegen_flags: <defaults>
</compile_context>

<pallas_src>
import functools

import jax
import jax.numpy as jnp
from jax.experimental import pallas as pl
from jax.experimental.pallas import tpu as pltpu


# ---------------------------------------------------------------------------
# small helpers
# ---------------------------------------------------------------------------
def _round_up(v, m):
    return ((v + m - 1) // m) * m


def _pick_row_tile(ho):
    for cand in (32, 16, 8, 4, 2):
        if ho % cand == 0:
            return cand
    return ho


def _pick_stats_tile(m):
    # largest divisible tile first (amortize ~0.35us per grid step)
    for cand in (4096, 2048, 1024, 512, 256, 128, 64, 32, 16, 8):
        if m % cand == 0:
            return cand
    return m


def _pick_chunk(rows, cout, budget=128 * 1024):
    """Largest multiple-of-8 divisor of `rows` whose f32 acc fits `budget`."""
    limit = max(8, budget // (cout * 4))
    best = 8
    d = 8
    while d <= rows:
        if rows % d == 0 and d <= limit:
            best = d
        d += 8
    return best


@functools.lru_cache(maxsize=None)
def _vmem_limit_bytes():
    # Per-generation VMEM budget (~75% of physical) instead of a hard-coded
    # 64 MiB (which is 100% of v7x VMEM, leaving no double-buffer headroom).
    try:
        cap = pltpu.get_tpu_info().vmem_capacity_bytes
        return int(cap * 3 // 4)
    except Exception:
        return 32 * 1024 * 1024


# ---------------------------------------------------------------------------
# Pallas kernels
# ---------------------------------------------------------------------------
def _conv3x3_kernel(*refs, wp, rows, s3len, rc, cout, fuse_norm, apply_silu,
                    has_residual, collect_stats):
    """Fused (GroupNorm+SiLU) -> 3x3 conv -> (+bias, +residual, +GN stats).

    The padded sample is resident in VMEM as a flattened (hp*wp+8, cin) bf16
    slab.  The kernel slices a (th+2)-row halo slab, optionally normalizes it
    (f32 math), builds the kx-folded slab3 ((th+2)*wp, 3*cin) bf16 in scratch,
    and accumulates 3 MXU matmuls (K = 3*cin) per row chunk into an f32 acc.
    Optionally accumulates masked per-channel sum / sum-of-squares of the conv
    output across the row-tile grid axis (fused GroupNorm stats).
    """
    it = iter(refs)
    x_ref = next(it)            # (1, hp*wp + 8, cin)  bf16, resident per sample
    w_ref = next(it)            # (3, 3*cin, cout)     bf16  (kx folded into K)
    b_ref = next(it)            # (1, cout)            f32
    if fuse_norm:
        scale_ref = next(it)    # (1, 1, cin) per-sample GN scale (f32)
        shift_ref = next(it)    # (1, 1, cin) per-sample GN shift (f32)
        imask_ref = next(it)    # (hp*wp + 8, 1) 1.0 on valid input pixels
    if has_residual:
        r_ref = next(it)        # (1, rows, cout) f32
    if collect_stats:
        omask_ref = next(it)    # (ho*wp, 1) 1.0 on valid output columns
    o_ref = next(it)            # (1, rows, cout) f32
    if collect_stats:
        s1_ref = next(it)       # (1, 1, cout) f32, resident across ti
        s2_ref = next(it)       # (1, 1, cout) f32, resident across ti
    slab3_scr = next(it)        # VMEM (s3len, 3*cin) bf16

    ti = pl.program_id(1)
    row_start = pl.multiple_of(ti * rows, 8)

    slab = x_ref[0, pl.ds(row_start, s3len + 8), :]          # bf16
    if fuse_norm:
        xf = slab.astype(jnp.float32)                        # VPU math in f32
        xn = xf * scale_ref[0] + shift_ref[0]
        if apply_silu:
            xn = xn * jax.nn.sigmoid(xn)                     # x * sigmoid(x)
        # re-zero conv zero-padding / alignment / overrun-guard rows
        xn = xn * imask_ref[pl.ds(row_start, s3len + 8), :]
        slab = xn.astype(jnp.bfloat16)
    # fold kx into K: slab3[r, kx*cin + c] = slab[r + kx, c]
    slab3_scr[...] = jnp.concatenate(
        [slab[0:s3len], slab[1:s3len + 1], slab[2:s3len + 2]], axis=-1)

    s1_acc = jnp.zeros((1, cout), jnp.float32)
    s2_acc = jnp.zeros((1, cout), jnp.float32)
    for c in range(rows // rc):                              # M-chunked acc
        r0 = c * rc                                          # static, mult of 8
        acc = jnp.zeros((rc, cout), jnp.float32)
        for ky in range(3):                                  # 3 matmuls, K=3*cin
            win = slab3_scr[pl.ds(ky * wp + r0, rc), :]      # aligned bf16 load
            acc = acc + jnp.dot(win, w_ref[ky],
                                preferred_element_type=jnp.float32)
        y = acc + b_ref[...]
        if has_residual:
            y = y + r_ref[0, pl.ds(r0, rc), :]
        o_ref[0, pl.ds(r0, rc), :] = y
        if collect_stats:
            ym = y * omask_ref[pl.ds(row_start + r0, rc), :]
            s1_acc = s1_acc + jnp.sum(ym, axis=0, keepdims=True)
            s2_acc = s2_acc + jnp.sum(ym * ym, axis=0, keepdims=True)

    if collect_stats:
        @pl.when(ti == 0)
        def _():
            s1_ref[0] = s1_acc
            s2_ref[0] = s2_acc

        @pl.when(ti != 0)
        def _():
            s1_ref[0] = s1_ref[0] + s1_acc
            s2_ref[0] = s2_ref[0] + s2_acc


def _gn_stats_kernel(x_ref, s1_ref, s2_ref):
    """Per-channel sum / sum-of-squares across spatial row tiles (used only for
    the post-downsample activation, where the conv-fused stats do not apply)."""
    x = x_ref[0]                                   # (ts, C) f32
    s1 = jnp.sum(x, axis=0, keepdims=True)
    s2 = jnp.sum(x * x, axis=0, keepdims=True)

    @pl.when(pl.program_id(1) == 0)
    def _():
        s1_ref[0] = s1
        s2_ref[0] = s2

    @pl.when(pl.program_id(1) != 0)
    def _():
        s1_ref[0] = s1_ref[0] + s1
        s2_ref[0] = s2_ref[0] + s2


# ---------------------------------------------------------------------------
# Wrappers (glue + pallas_call)
# ---------------------------------------------------------------------------
def conv3x3(x, w_hwio, b, *, pads=((1, 1), (1, 1)), norm=None, silu=False,
            residual=None, collect_stats=False):
    """3x3 stride-1 conv on NHWC input with optional fused GroupNorm(+SiLU)
    prologue, fused residual-add epilogue and fused GN-stats epilogue.

    Returns out (N,Ho,Wo,Cout) [, s1 (N,Cout), s2 (N,Cout) if collect_stats]."""
    n, h, w_in, cin = x.shape
    cout = w_hwio.shape[-1]
    (pt, pb), (pleft, pright) = pads
    ho = h + pt + pb - 2
    wo = w_in + pleft + pright - 2
    wp = _round_up(wo + 2, 8)            # padded width, multiple of 8
    hp = ho + 2

    # zero-pad (conv pad + lane-alignment pad), flatten H*W, add 8 overrun-guard
    # rows for the last tile's halo, cast to bf16 (MXU operand dtype).
    xp = jnp.pad(x, ((0, 0), (pt, pb), (pleft, wp - w_in - pleft), (0, 0)))
    x2 = jnp.pad(xp.reshape(n, hp * wp, cin), ((0, 0), (0, 8), (0, 0)))
    x2 = x2.astype(jnp.bfloat16)

    th = _pick_row_tile(ho)
    nt = ho // th
    rows = th * wp
    s3len = (th + 2) * wp
    rc = _pick_chunk(rows, cout)

    w3 = w_hwio.reshape(3, 3 * cin, cout).astype(jnp.bfloat16)
    bvec = b.reshape(1, cout).astype(jnp.float32)

    in_specs = [
        pl.BlockSpec((1, hp * wp + 8, cin), lambda bi, ti: (bi, 0, 0)),
        pl.BlockSpec((3, 3 * cin, cout), lambda bi, ti: (0, 0, 0)),
        pl.BlockSpec((1, cout), lambda bi, ti: (0, 0)),
    ]
    args = [x2, w3, bvec]

    if norm is not None:
        scale, shift = norm                              # (n, cin) each, f32
        ridx = jnp.arange(hp)[:, None]
        cidx = jnp.arange(wp)[None, :]
        valid = ((ridx >= pt) & (ridx < pt + h)
                 & (cidx >= pleft) & (cidx < pleft + w_in))
        imask = valid.astype(jnp.float32).reshape(hp * wp, 1)
        imask = jnp.pad(imask, ((0, 8), (0, 0)))
        in_specs += [
            pl.BlockSpec((1, 1, cin), lambda bi, ti: (bi, 0, 0)),
            pl.BlockSpec((1, 1, cin), lambda bi, ti: (bi, 0, 0)),
            pl.BlockSpec((hp * wp + 8, 1), lambda bi, ti: (0, 0)),
        ]
        args += [scale.reshape(n, 1, cin).astype(jnp.float32),
                 shift.reshape(n, 1, cin).astype(jnp.float32), imask]

    if residual is not None:
        rp = jnp.pad(residual, ((0, 0), (0, 0), (0, wp - wo), (0, 0)))
        r2 = rp.reshape(n, ho * wp, cout).astype(jnp.float32)
        in_specs.append(pl.BlockSpec((1, rows, cout),
                                     lambda bi, ti: (bi, ti, 0)))
        args.append(r2)

    if collect_stats:
        omask = (jnp.arange(wp)[None, :] < wo).astype(jnp.float32)
        omask = jnp.broadcast_to(omask, (ho, wp)).reshape(ho * wp, 1)
        in_specs.append(pl.BlockSpec((ho * wp, 1), lambda bi, ti: (0, 0)))
        args.append(omask)

    kernel = functools.partial(
        _conv3x3_kernel, wp=wp, rows=rows, s3len=s3len, rc=rc, cout=cout,
        fuse_norm=norm is not None, apply_silu=silu,
        has_residual=residual is not None, collect_stats=collect_stats)

    o_shape = jax.ShapeDtypeStruct((n, ho * wp, cout), jnp.float32)
    o_spec = pl.BlockSpec((1, rows, cout), lambda bi, ti: (bi, ti, 0))
    if collect_stats:
        out_shape = (o_shape,
                     jax.ShapeDtypeStruct((n, 1, cout), jnp.float32),
                     jax.ShapeDtypeStruct((n, 1, cout), jnp.float32))
        out_specs = (o_spec,
                     pl.BlockSpec((1, 1, cout), lambda bi, ti: (bi, 0, 0)),
                     pl.BlockSpec((1, 1, cout), lambda bi, ti: (bi, 0, 0)))
        dims = ("parallel", "arbitrary")   # ti carries the stats accumulation
    else:
        out_shape = o_shape
        out_specs = o_spec
        dims = ("parallel", "parallel")    # both axes independent (v7x 2 TCs)

    outs = pl.pallas_call(
        kernel,
        out_shape=out_shape,
        grid=(n, nt),
        in_specs=in_specs,
        out_specs=out_specs,
        scratch_shapes=[pltpu.VMEM((s3len, 3 * cin), jnp.bfloat16)],
        compiler_params=pltpu.CompilerParams(
            dimension_semantics=dims,
            vmem_limit_bytes=_vmem_limit_bytes()),
    )(*args)

    if collect_stats:
        out2, s1, s2 = outs
    else:
        out2 = outs
    out = out2.reshape(n, ho, wp, cout)[:, :, :wo, :]
    if collect_stats:
        return out, s1[:, 0, :], s2[:, 0, :]
    return out


def gn_stats(x):
    """Per-channel (sum, sum-of-squares) over H*W via a tiled Pallas reduction."""
    n, h, w, c = x.shape
    m = h * w
    ts = _pick_stats_tile(m)
    x2 = x.reshape(n, m, c)
    s1, s2 = pl.pallas_call(
        _gn_stats_kernel,
        out_shape=(jax.ShapeDtypeStruct((n, 1, c), jnp.float32),
                   jax.ShapeDtypeStruct((n, 1, c), jnp.float32)),
        grid=(n, m // ts),
        in_specs=[pl.BlockSpec((1, ts, c), lambda bi, ti: (bi, ti, 0))],
        out_specs=(pl.BlockSpec((1, 1, c), lambda bi, ti: (bi, 0, 0)),
                   pl.BlockSpec((1, 1, c), lambda bi, ti: (bi, 0, 0))),
        compiler_params=pltpu.CompilerParams(
            dimension_semantics=("parallel", "arbitrary"),
            vmem_limit_bytes=_vmem_limit_bytes()),
    )(x2)
    return s1[:, 0, :], s2[:, 0, :]


def _gn_affine_from_stats(s1, s2, gamma, beta, *, num_groups, count, eps=1e-6):
    """Turn per-channel (sum, sumsq) into per-sample, per-channel (scale, shift)
    so that x * scale + shift == GroupNorm(x) (tiny plain-JAX math)."""
    n, c = s1.shape
    cg = c // num_groups
    tot = float(count * cg)
    g1 = s1.reshape(n, num_groups, cg).sum(axis=-1)
    g2 = s2.reshape(n, num_groups, cg).sum(axis=-1)
    mean = g1 / tot
    var = jnp.maximum(g2 / tot - mean * mean, 0.0)          # clamp >= 0
    inv = jax.lax.rsqrt(var + eps)
    mean_c = jnp.repeat(mean, cg, axis=1)                   # (n, c)
    inv_c = jnp.repeat(inv, cg, axis=1)                     # (n, c)
    scale = inv_c * gamma[None, :]
    shift = beta[None, :] - mean_c * scale
    return scale, shift


# ---------------------------------------------------------------------------
# Parameters (deterministic synthetic init) and forward pass
# ---------------------------------------------------------------------------
def init_params(key, *, in_channels, hidden_channels, num_downsample, num_res,
                hidden_dim):
    def conv_init(k, cin, cout):
        kw, kb = jax.random.split(k)
        w = jax.random.normal(kw, (3, 3, cin, cout), jnp.float32) * 0.05
        b = jax.random.normal(kb, (cout,), jnp.float32) * 0.05
        return w, b

    def norm_init(k, c):
        kg, kb = jax.random.split(k)
        g = 1.0 + 0.1 * jax.random.normal(kg, (c,), jnp.float32)
        b = 0.1 * jax.random.normal(kb, (c,), jnp.float32)
        return g, b

    n_keys = 4 + num_downsample * (4 * num_res + 1)
    keys = iter(jax.random.split(key, n_keys))
    params = {}
    params["in_conv_w"], params["in_conv_b"] = conv_init(
        next(keys), in_channels, hidden_channels)
    blocks = []
    for _ in range(num_downsample):
        res = []
        for _ in range(num_res):
            g1, b1 = norm_init(next(keys), hidden_channels)
            w1, c1 = conv_init(next(keys), hidden_channels, hidden_channels)
            g2, b2 = norm_init(next(keys), hidden_channels)
            w2, c2 = conv_init(next(keys), hidden_channels, hidden_channels)
            res.append(dict(gamma1=g1, beta1=b1, w1=w1, b1=c1,
                            gamma2=g2, beta2=b2, w2=w2, b2=c2))
        dw, db = conv_init(next(keys), hidden_channels, hidden_channels)
        blocks.append(dict(res=res, down=dict(w=dw, b=db)))
    params["blocks"] = blocks
    params["norm_out_gamma"], params["norm_out_beta"] = norm_init(
        next(keys), hidden_channels)
    params["out_conv_w"], params["out_conv_b"] = conv_init(
        next(keys), hidden_channels, hidden_dim)
    return params


def cnn_encoder_forward(x_nchw, params, *, num_downsample, num_res,
                        norm_groups):
    # PyTorch NCHW input -> NHWC for the kernels.
    x = jnp.transpose(x_nchw.astype(jnp.float32), (0, 2, 3, 1))
    # in_conv also emits the GN stats for the next GroupNorm.
    x, s1, s2 = conv3x3(x, params["in_conv_w"], params["in_conv_b"],
                        collect_stats=True)
    for d in range(num_downsample):
        blk = params["blocks"][d]
        for r in range(num_res):
            p = blk["res"][r]
            cnt = x.shape[1] * x.shape[2]
            sc1, sh1 = _gn_affine_from_stats(s1, s2, p["gamma1"], p["beta1"],
                                             num_groups=norm_groups, count=cnt)
            h, hs1, hs2 = conv3x3(x, p["w1"], p["b1"], norm=(sc1, sh1),
                                  silu=True, collect_stats=True)
            sc2, sh2 = _gn_affine_from_stats(hs1, hs2, p["gamma2"], p["beta2"],
                                             num_groups=norm_groups, count=cnt)
            # TODO(synk): nn.Dropout is treated as identity (eval-mode semantics).
            x, s1, s2 = conv3x3(h, p["w2"], p["b2"], norm=(sc2, sh2), silu=True,
                                residual=x, collect_stats=True)  # x + h fused
        # Downsample.with_conv: F.pad(x,(0,1,0,1)) + 3x3 stride-2 conv ==
        # stride-1 conv on ((0,2),(0,2))-padded input, subsampled by 2
        # (matches the PyTorch output for any input parity).
        y = conv3x3(x, blk["down"]["w"], blk["down"]["b"],
                    pads=((0, 2), (0, 2)))
        ho2 = (x.shape[1] - 2) // 2 + 1
        wo2 = (x.shape[2] - 2) // 2 + 1
        x = y[:, ::2, ::2, :][:, :ho2, :wo2, :]
        s1, s2 = gn_stats(x)            # TODO(synk): fuse via strided downsample
    cnt = x.shape[1] * x.shape[2]
    scn, shn = _gn_affine_from_stats(s1, s2, params["norm_out_gamma"],
                                     params["norm_out_beta"],
                                     num_groups=norm_groups, count=cnt)
    x = conv3x3(x, params["out_conv_w"], params["out_conv_b"],
                norm=(scn, shn), silu=False)
    return jnp.transpose(x, (0, 3, 1, 2))                # back to NCHW


# ---------------------------------------------------------------------------
# Pure-JAX reference for correctness check
# ---------------------------------------------------------------------------
def _ref_conv(x, w, b, stride=1, padding=((1, 1), (1, 1))):
    y = jax.lax.conv_general_dilated(
        x, w, (stride, stride), padding,
        dimension_numbers=("NHWC", "HWIO", "NHWC"),
        precision=jax.lax.Precision.HIGHEST)
    return y + b


def _ref_groupnorm(x, gamma, beta, num_groups, apply_silu):
    n, h, w, c = x.shape
    xg = x.reshape(n, h, w, num_groups, c // num_groups)
    mean = xg.mean(axis=(1, 2, 4), keepdims=True)
    var = ((xg - mean) ** 2).mean(axis=(1, 2, 4), keepdims=True)
    y = ((xg - mean) / jnp.sqrt(var + 1e-6)).reshape(n, h, w, c)
    y = y * gamma + beta
    if apply_silu:
        y = y * jax.nn.sigmoid(y)
    return y


def _ref_forward(x_nchw, params, *, num_downsample, num_res, norm_groups):
    x = jnp.transpose(x_nchw.astype(jnp.float32), (0, 2, 3, 1))
    x = _ref_conv(x, params["in_conv_w"], params["in_conv_b"])
    for d in range(num_downsample):
        blk = params["blocks"][d]
        for r in range(num_res):
            p = blk["res"][r]
            h = _ref_groupnorm(x, p["gamma1"], p["beta1"], norm_groups, True)
            h = _ref_conv(h, p["w1"], p["b1"])
            h = _ref_groupnorm(h, p["gamma2"], p["beta2"], norm_groups, True)
            x = x + _ref_conv(h, p["w2"], p["b2"])
        x = _ref_conv(x, blk["down"]["w"], blk["down"]["b"], stride=2,
                      padding=((0, 1), (0, 1)))
    x = _ref_groupnorm(x, params["norm_out_gamma"], params["norm_out_beta"],
                       norm_groups, False)
    x = _ref_conv(x, params["out_conv_w"], params["out_conv_b"])
    return jnp.transpose(x, (0, 3, 1, 2))


# ---------------------------------------------------------------------------
if __name__ == "__main__":
    B, IN_CH, H, W = 2, 4, 16, 16
    HIDDEN_CH, HIDDEN_DIM = 32, 32
    NUM_DOWN, NUM_RES, NORM_GROUPS = 1, 1, 8

    key = jax.random.PRNGKey(0)
    kx, kp = jax.random.split(key)
    x = jax.random.normal(kx, (B, IN_CH, H, W), jnp.float32)
    params = init_params(kp, in_channels=IN_CH, hidden_channels=HIDDEN_CH,
                         num_downsample=NUM_DOWN, num_res=NUM_RES,
                         hidden_dim=HIDDEN_DIM)

    out = cnn_encoder_forward(x, params, num_downsample=NUM_DOWN,
                              num_res=NUM_RES, norm_groups=NORM_GROUPS)
    out = jax.block_until_ready(out)

    expected_shape = (B, HIDDEN_DIM, H // (2 ** NUM_DOWN), W // (2 ** NUM_DOWN))
    assert out.shape == expected_shape, (out.shape, expected_shape)

    ref = jax.block_until_ready(
        _ref_forward(x, params, num_downsample=NUM_DOWN, num_res=NUM_RES,
                     norm_groups=NORM_GROUPS))
    # bf16 MXU operands (per perf review) vs the f32 reference conv -> loosen
    # the tolerance slightly; the pipeline is otherwise value-identical.
    max_err = float(jnp.max(jnp.abs(out - ref)))
    assert jnp.allclose(out, ref, atol=5e-2, rtol=5e-2), max_err

    print("KERNEL_OK")
</pallas_src>

<mosaic_0001>
module attributes {stable_mosaic.version = 11 : i64} {
  func.func @_conv3x3_kernel(%arg0: i32, %arg1: i32, %arg2: memref<1x440x4xbf16, #tpu.memory_space<vmem>>, %arg3: memref<3x12x32xbf16, #tpu.memory_space<vmem>>, %arg4: memref<1x32xf32, #tpu.memory_space<vmem>>, %arg5: memref<384x1xf32, #tpu.memory_space<vmem>>, %arg6: memref<1x384x32xf32, #tpu.memory_space<vmem>>, %arg7: memref<1x1x32xf32, #tpu.memory_space<vmem>>, %arg8: memref<1x1x32xf32, #tpu.memory_space<vmem>>, %arg9: memref<432x12xbf16, #tpu.memory_space<vmem>>) attributes {dimension_semantics = [#tpu.dimension_semantics<parallel>, #tpu.dimension_semantics<arbitrary>], iteration_bounds = array<i64: 2, 1>, scalar_prefetch = 0 : i64, scratch_operands = 1 : i64, tpu.core_type = #tpu.core_type<tc>, window_params = [{transform_indices = @transform_0, window_bounds = array<i64: 1, 440, 4>}, {pipeline_mode = #tpu.pipeline_mode<synchronous>, transform_indices = @transform_1, window_bounds = array<i64: 3, 12, 32>}, {pipeline_mode = #tpu.pipeline_mode<synchronous>, transform_indices = @transform_2, window_bounds = array<i64: 1, 32>}, {pipeline_mode = #tpu.pipeline_mode<synchronous>, transform_indices = @transform_3, window_bounds = array<i64: 384, 1>}, {transform_indices = @transform_4, window_bounds = array<i64: 1, 384, 32>}, {transform_indices = @transform_5, window_bounds = array<i64: 1, 1, 32>}, {transform_indices = @transform_6, window_bounds = array<i64: 1, 1, 32>}]} {
    %c384_i32 = arith.constant 384 : i32
    %0 = arith.muli %arg1, %c384_i32 : i32
    %1 = tpu.assume_multiple %0, 8 : i32
    %c0 = arith.constant 0 : index
    %2 = arith.index_cast %1 : i32 to index
    %c0_0 = arith.constant 0 : index
    %3 = vector.load %arg2[%c0, %2, %c0_0] : memref<1x440x4xbf16, #tpu.memory_space<vmem>>, vector<1x440x4xbf16>
    %4 = vector.shape_cast %3 : vector<1x440x4xbf16> to vector<440x4xbf16>
    %5 = vector.extract_strided_slice %4 {offsets = [0, 0], sizes = [432, 4], strides = [1, 1]} : vector<440x4xbf16> to vector<432x4xbf16>
    %6 = vector.extract_strided_slice %4 {offsets = [1, 0], sizes = [432, 4], strides = [1, 1]} : vector<440x4xbf16> to vector<432x4xbf16>
    %7 = vector.extract_strided_slice %4 {offsets = [2, 0], sizes = [432, 4], strides = [1, 1]} : vector<440x4xbf16> to vector<432x4xbf16>
    %8 = tpu.concatenate %5, %6, %7 in 1 : vector<432x4xbf16>, vector<432x4xbf16>, vector<432x4xbf16> -> vector<432x12xbf16>
    %c0_1 = arith.constant 0 : index
    %c0_2 = arith.constant 0 : index
    %9 = vector.load %arg9[%c0_1, %c0_2] : memref<432x12xbf16, #tpu.memory_space<vmem>>, vector<432x12xbf16>
    tpu.vector_store %arg9[%c0_1, %c0_2], %8 {strides = array<i32>} : memref<432x12xbf16, #tpu.memory_space<vmem>>, vector<432x12xbf16>,
    %cst = arith.constant 0.000000e+00 : f32
    %10 = vector.broadcast %cst : f32 to vector<1x32xf32>
    %cst_3 = arith.constant 0.000000e+00 : f32
    %11 = vector.broadcast %cst_3 : f32 to vector<1x32xf32>
    %cst_4 = arith.constant 0.000000e+00 : f32
    %12 = vector.broadcast %cst_4 : f32 to vector<384x32xf32>
    %c0_5 = arith.constant 0 : index
    %c0_6 = arith.constant 0 : index
    %13 = vector.load %arg9[%c0_5, %c0_6] : memref<432x12xbf16, #tpu.memory_space<vmem>>, vector<384x12xbf16>
    %c0_7 = arith.constant 0 : index
    %c0_8 = arith.constant 0 : index
    %c0_9 = arith.constant 0 : index
    %14 = vector.load %arg3[%c0_7, %c0_8, %c0_9] : memref<3x12x32xbf16, #tpu.memory_space<vmem>>, vector<1x12x32xbf16>
    %15 = vector.shape_cast %14 : vector<1x12x32xbf16> to vector<12x32xbf16>
    %cst_10 = arith.constant dense<0.000000e+00> : vector<384x32xf32>
    %16 = tpu.matmul %13, %15, %cst_10 {dimension_numbers = #tpu.dot_dimension_numbers<[1], [0], [0], [1], [0, 0, 1, 1], [], []>} : vector<384x12xbf16>, vector<12x32xbf16>, vector<384x32xf32> -> vector<384x32xf32>
    %17 = arith.addf %12, %16 : vector<384x32xf32>
    %c24 = arith.constant 24 : index
    %c0_11 = arith.constant 0 : index
    %18 = vector.load %arg9[%c24, %c0_11] : memref<432x12xbf16, #tpu.memory_space<vmem>>, vector<384x12xbf16>
    %c1 = arith.constant 1 : index
    %c0_12 = arith.constant 0 : index
    %c0_13 = arith.constant 0 : index
    %19 = vector.load %arg3[%c1, %c0_12, %c0_13] : memref<3x12x32xbf16, #tpu.memory_space<vmem>>, vector<1x12x32xbf16>
    %20 = vector.shape_cast %19 : vector<1x12x32xbf16> to vector<12x32xbf16>
    %cst_14 = arith.constant dense<0.000000e+00> : vector<384x32xf32>
    %21 = tpu.matmul %18, %20, %cst_14 {dimension_numbers = #tpu.dot_dimension_numbers<[1], [0], [0], [1], [0, 0, 1, 1], [], []>} : vector<384x12xbf16>, vector<12x32xbf16>, vector<384x32xf32> -> vector<384x32xf32>
    %22 = arith.addf %17, %21 : vector<384x32xf32>
    %c48 = arith.constant 48 : index
    %c0_15 = arith.constant 0 : index
    %23 = vector.load %arg9[%c48, %c0_15] : memref<432x12xbf16, #tpu.memory_space<vmem>>, vector<384x12xbf16>
    %c2 = arith.constant 2 : index
    %c0_16 = arith.constant 0 : index
    %c0_17 = arith.constant 0 : index
    %24 = vector.load %arg3[%c2, %c0_16, %c0_17] : memref<3x12x32xbf16, #tpu.memory_space<vmem>>, vector<1x12x32xbf16>
    %25 = vector.shape_cast %24 : vector<1x12x32xbf16> to vector<12x32xbf16>
    %cst_18 = arith.constant dense<0.000000e+00> : vector<384x32xf32>
    %26 = tpu.matmul %23, %25, %cst_18 {dimension_numbers = #tpu.dot_dimension_numbers<[1], [0], [0], [1], [0, 0, 1, 1], [], []>} : vector<384x12xbf16>, vector<12x32xbf16>, vector<384x32xf32> -> vector<384x32xf32>
    %27 = arith.addf %22, %26 : vector<384x32xf32>
    %c0_19 = arith.constant 0 : index
    %c0_20 = arith.constant 0 : index
    %28 = vector.load %arg4[%c0_19, %c0_20] : memref<1x32xf32, #tpu.memory_space<vmem>>, vector<1x32xf32>
    %29 = vector.broadcast %28 : vector<1x32xf32> to vector<384x32xf32>
    %30 = arith.addf %27, %29 : vector<384x32xf32>
    %c0_21 = arith.constant 0 : index
    %c0_22 = arith.constant 0 : index
    %c0_23 = arith.constant 0 : index
    %31 = vector.load %arg6[%c0_21, %c0_22, %c0_23] : memref<1x384x32xf32, #tpu.memory_space<vmem>>, vector<1x384x32xf32>
    %32 = vector.shape_cast %31 : vector<1x384x32xf32> to vector<384x32xf32>
    %33 = vector.shape_cast %30 : vector<384x32xf32> to vector<1x384x32xf32>
    tpu.vector_store %arg6[%c0_21, %c0_22, %c0_23], %33 {strides = array<i32>} : memref<1x384x32xf32, #tpu.memory_space<vmem>>, vector<1x384x32xf32>,
    %c0_i32 = arith.constant 0 : i32
    %34 = arith.addi %1, %c0_i32 : i32
    %35 = arith.index_cast %34 : i32 to index
    %c0_24 = arith.constant 0 : index
    %36 = vector.load %arg5[%35, %c0_24] : memref<384x1xf32, #tpu.memory_space<vmem>>, vector<384x1xf32>
    %37 = vector.broadcast %36 : vector<384x1xf32> to vector<384x32xf32>
    %38 = arith.mulf %30, %37 : vector<384x32xf32>
    %cst_25 = arith.constant dense<0.000000e+00> : vector<32xf32>
    %39 = vector.multi_reduction <add>, %38, %cst_25 [0] : vector<384x32xf32> to vector<32xf32>
    %40 = vector.shape_cast %39 : vector<32xf32> to vector<1x32xf32>
    %41 = arith.addf %10, %40 : vector<1x32xf32>
    %42 = arith.mulf %38, %38 : vector<384x32xf32>
    %cst_26 = arith.constant dense<0.000000e+00> : vector<32xf32>
    %43 = vector.multi_reduction <add>, %42, %cst_26 [0] : vector<384x32xf32> to vector<32xf32>
    %44 = vector.shape_cast %43 : vector<32xf32> to vector<1x32xf32>
    %45 = arith.addf %11, %44 : vector<1x32xf32>
    %c0_i32_27 = arith.constant 0 : i32
    %46 = arith.cmpi eq, %arg1, %c0_i32_27 : i32
    %47 = arith.extui %46 : i1 to i32
    %c0_i32_28 = arith.constant 0 : i32
    %48 = arith.cmpi ne, %47, %c0_i32_28 : i32
    scf.if %48 {
      %c0_31 = arith.constant 0 : index
      %c0_32 = arith.constant 0 : index
      %c0_33 = arith.constant 0 : index
      %52 = vector.load %arg7[%c0_31, %c0_32, %c0_33] : memref<1x1x32xf32, #tpu.memory_space<vmem>>, vector<1x1x32xf32>
      %53 = vector.shape_cast %52 : vector<1x1x32xf32> to vector<1x32xf32>
      %54 = vector.shape_cast %41 : vector<1x32xf32> to vector<1x1x32xf32>
      tpu.vector_store %arg7[%c0_31, %c0_32, %c0_33], %54 {strides = array<i32>} : memref<1x1x32xf32, #tpu.memory_space<vmem>>, vector<1x1x32xf32>,
      %c0_34 = arith.constant 0 : index
      %c0_35 = arith.constant 0 : index
      %c0_36 = arith.constant 0 : index
      %55 = vector.load %arg8[%c0_34, %c0_35, %c0_36] : memref<1x1x32xf32, #tpu.memory_space<vmem>>, vector<1x1x32xf32>
      %56 = vector.shape_cast %55 : vector<1x1x32xf32> to vector<1x32xf32>
      %57 = vector.shape_cast %45 : vector<1x32xf32> to vector<1x1x32xf32>
      tpu.vector_store %arg8[%c0_34, %c0_35, %c0_36], %57 {strides = array<i32>} : memref<1x1x32xf32, #tpu.memory_space<vmem>>, vector<1x1x32xf32>,
    } else {
    }
    %c0_i32_29 = arith.constant 0 : i32
    %49 = arith.cmpi ne, %arg1, %c0_i32_29 : i32
    %50 = arith.extui %49 : i1 to i32
    %c0_i32_30 = arith.constant 0 : i32
    %51 = arith.cmpi ne, %50, %c0_i32_30 : i32
    scf.if %51 {
      %c0_31 = arith.constant 0 : index
      %c0_32 = arith.constant 0 : index
      %c0_33 = arith.constant 0 : index
      %52 = vector.load %arg7[%c0_31, %c0_32, %c0_33] : memref<1x1x32xf32, #tpu.memory_space<vmem>>, vector<1x1x32xf32>
      %53 = vector.shape_cast %52 : vector<1x1x32xf32> to vector<1x32xf32>
      %54 = arith.addf %53, %41 : vector<1x32xf32>
      %c0_34 = arith.constant 0 : index
      %c0_35 = arith.constant 0 : index
      %c0_36 = arith.constant 0 : index
      %55 = vector.load %arg7[%c0_34, %c0_35, %c0_36] : memref<1x1x32xf32, #tpu.memory_space<vmem>>, vector<1x1x32xf32>
      %56 = vector.shape_cast %55 : vector<1x1x32xf32> to vector<1x32xf32>
      %57 = vector.shape_cast %54 : vector<1x32xf32> to vector<1x1x32xf32>
      tpu.vector_store %arg7[%c0_34, %c0_35, %c0_36], %57 {strides = array<i32>} : memref<1x1x32xf32, #tpu.memory_space<vmem>>, vector<1x1x32xf32>,
      %c0_37 = arith.constant 0 : index
      %c0_38 = arith.constant 0 : index
      %c0_39 = arith.constant 0 : index
      %58 = vector.load %arg8[%c0_37, %c0_38, %c0_39] : memref<1x1x32xf32, #tpu.memory_space<vmem>>, vector<1x1x32xf32>
      %59 = vector.shape_cast %58 : vector<1x1x32xf32> to vector<1x32xf32>
      %60 = arith.addf %59, %45 : vector<1x32xf32>
      %c0_40 = arith.constant 0 : index
      %c0_41 = arith.constant 0 : index
      %c0_42 = arith.constant 0 : index
      %61 = vector.load %arg8[%c0_40, %c0_41, %c0_42] : memref<1x1x32xf32, #tpu.memory_space<vmem>>, vector<1x1x32xf32>
      %62 = vector.shape_cast %61 : vector<1x1x32xf32> to vector<1x32xf32>
      %63 = vector.shape_cast %60 : vector<1x32xf32> to vector<1x1x32xf32>
      tpu.vector_store %arg8[%c0_40, %c0_41, %c0_42], %63 {strides = array<i32>} : memref<1x1x32xf32, #tpu.memory_space<vmem>>, vector<1x1x32xf32>,
    } else {
    }
    return
  }
  func.func @transform_0(%arg0: i32, %arg1: i32) -> (i32, i32, i32) {
    %c0_i32 = arith.constant 0 : i32
    %c0_i32_0 = arith.constant 0 : i32
    %c0_i32_1 = arith.constant 0 : i32
    return %arg0, %c0_i32, %c0_i32_0 : i32, i32, i32
  }
  func.func @transform_1(%arg0: i32, %arg1: i32) -> (i32, i32, i32) {
    %c0_i32 = arith.constant 0 : i32
    %c0_i32_0 = arith.constant 0 : i32
    %c0_i32_1 = arith.constant 0 : i32
    %c0_i32_2 = arith.constant 0 : i32
    return %c0_i32, %c0_i32_0, %c0_i32_1 : i32, i32, i32
  }
  func.func @transform_2(%arg0: i32, %arg1: i32) -> (i32, i32) {
    %c0_i32 = arith.constant 0 : i32
    %c0_i32_0 = arith.constant 0 : i32
    %c0_i32_1 = arith.constant 0 : i32
    return %c0_i32, %c0_i32_0 : i32, i32
  }
  func.func @transform_3(%arg0: i32, %arg1: i32) -> (i32, i32) {
    %c0_i32 = arith.constant 0 : i32
    %c0_i32_0 = arith.constant 0 : i32
    %c0_i32_1 = arith.constant 0 : i32
    return %c0_i32, %c0_i32_0 : i32, i32
  }
  func.func @transform_4(%arg0: i32, %arg1: i32) -> (i32, i32, i32) {
    %c0_i32 = arith.constant 0 : i32
    %c0_i32_0 = arith.constant 0 : i32
    return %arg0, %arg1, %c0_i32 : i32, i32, i32
  }
  func.func @transform_5(%arg0: i32, %arg1: i32) -> (i32, i32, i32) {
    %c0_i32 = arith.constant 0 : i32
    %c0_i32_0 = arith.constant 0 : i32
    %c0_i32_1 = arith.constant 0 : i32
    return %arg0, %c0_i32, %c0_i32_0 : i32, i32, i32
  }
  func.func @transform_6(%arg0: i32, %arg1: i32) -> (i32, i32, i32) {
    %c0_i32 = arith.constant 0 : i32
    %c0_i32_0 = arith.constant 0 : i32
    %c0_i32_1 = arith.constant 0 : i32
    return %arg0, %c0_i32, %c0_i32_0 : i32, i32, i32
  }
}

</mosaic_0001>

<bundles_post_ra>
// kernel: tpu_custom_call.1
= control target key start
LH: loop header
LB: loop body
LE: loop exit
PB: predicated region body
PF: predicated region fallthrough
CT: control target
= control target key end

     0   :  { %12 = vsyncpa [#allocation4], 0  ;;  %s5781_s0 = inlined_call_operand.vmem [shape: bf16[2,440,4], index: 0, kind: input, shape index: {}]   ;;  %s5782_s1 = inlined_call_operand.vmem [shape: bf16[3,12,32], index: 1, kind: input, shape index: {}]   ;;  %s5783_s2 = inlined_call_operand.vmem [shape: f32[1,32], index: 2, kind: input, shape index: {}]   ;;  %s5784_s3 = inlined_call_operand.vmem [shape: f32[384,1], index: 3, kind: input, shape index: {}]   ;;  %s5785_s4 = inlined_call_operand.vmem [shape: f32[2,384,32], index: 4, kind: output, shape index: {0}]   ;;  %s5786_s5 = inlined_call_operand.hbm [shape: f32[2,1,32], index: 5, kind: output, shape index: {1}]   ;;  %s5787_s6 = inlined_call_operand.hbm [shape: f32[2,1,32], index: 6, kind: output, shape index: {2}]  }
   0x1   :  { %14 = vsyncpa [#allocation4 + $0x1], 0 }
   0x2   :  { %15 = vsyncpa [#allocation6], 0 }
   0x3   :  { %17 = vsyncpa [#allocation6 + $0x1], 0  ;;  %s4238_s21 = smov 0   ;;  %s4240_s22 = smov 0  }
   0x4   :  { %s4242_s23 = smov 0   ;;  %s4244_s24 = smov 0  }
   0x5   :  { %s4246_s25 = smov 0   ;;  %s4248_s26 = smov 0  }
   0x6 LB: > { %s3460_s27 = sadd.s32 4294967295, %s4196_s26   ;;  %s3461_s28 = sadd.s32 4294967294, %s4196_s26   ;;  %s4196_s26 = sphi %s4248_s26, %s23_s26   ;;  %s4192_s25 = sphi %s4246_s25, %s5832_s25   ;;  %s4188_s24 = sphi %s4244_s24, %s5831_s24   ;;  %s4184_s23 = sphi %s4242_s23, %s5830_s23   ;;  %s4180_s22 = sphi %s4240_s22, %s5829_s22   ;;  %s4176_s21 = sphi %s4238_s21, %s5828_s21  }
   0x7   : > { %s35_s29 = sadd.s32 1, %s4192_s25  ;;  %s159_s30 = sadd.s32 1, %s4184_s23 }
   0x8   : > { %p37_p0 = scmp.ge.s32.totalorder %s35_s29, 2  ;;  %p169_p1 = scmp.ne.s32.totalorder %s4184_s23, %s4180_s22 }
   0x9   : > { %p170_p2 = scmp.eq.s32.totalorder %s3460_s27, 1  ;;  %p175_p3 = scmp.ne.s32.totalorder %s4180_s22, %s4176_s21 }
   0xa   : > { %s5834_s29 = smov (%p37_p0, %s35_s29), 0  ;;  %p176_p5 = scmp.eq.s32.totalorder %s3461_s28, 1 }
   0xb   : > { %p4278_p4 = por %p170_p2, %p169_p1  ;;  %s156_s8 = ssub.s32 %s4192_s25, %s5834_s29 }
   0xc   : > { %p3464_p6 = scmp.ge.s32.totalorder %s4196_s26, 1  ;;  %p157_p7 = scmp.eq.s32.totalorder %s156_s8, 0 }
   0xd   : > { %p4285_p8 = por %p176_p5, %p175_p3  ;;  %p237_p9 = scmp.lt.s32.totalorder %s4196_s26, 3 }
   0xe   : > { %s4291_s10 = scalar_select %p157_p7, %s4184_s23, %s159_s30  }
   0xf   : > { %p238_p10 = pnand %p3464_p6, %p237_p9 }
  0x11   : > { %241 = sbr.rel (%p238_p10) target bundleno = 624 (0x270), region = 36 }
  0x16   : > { %p279_p11 = scmp.lt.s32.totalorder %s4188_s24, 1  ;;  %vm768_vm0 = vcmask 1046528   ;;  %vm493_vm1 = vsmask.f32 7424  ;;  %s4198_s16 = smov 8   ;;  %vm1486_vm2 = vcmask 1045504  }
  0x17   : > { %s4199_s17 = smov 4   ;;  %vm878_vm3 = vcmask 31744   ;;  %vm933_vm4 = vcmask 64512   ;;  %vm1177_vm5 = vcmask 93184   ;;  %vm1413_vm6 = vcmask 97280   ;;  %s5692_s20 = sand.u32 1, %s4180_s22  }
  0x18   : > { %s4295_s11 = scalar_select %p279_p11, %s4188_s24, 1  ;;  %vm2629_vm7 = vcmask 261120   ;;  %vm3271_vm8 = vcmask 253952  }
  0x19   : > { %s3701_s27 = sshll.u32 %s4188_s24, 4  ;;  %s5788_s28 = scalar_lea.vmem [#allocation5], %s5692_s20 }
  0x1a   : > { %s3936_s12 = smul.u32 220, %s4295_s11  ;;  %s3328_s30 = sshll.u32 %s5788_s28, 4  ;;  %s5712_s30 = int_to_ptr.vmem [resolvable:$true] %s3328_s30 }
  0x1b   : > { %s5710_s14 = scalar_lea.hbm %s5787_s6, %s3701_s27  ;;  %s4201_s19 = smov [#allocation3]  }
  0x1c   : > { %s4301_s15 = scalar_lea.vmem %s5781_s0, %s3936_s12  ;;  %s5702_s12 = scalar_lea.hbm %s5786_s5, %s3701_s27 }
  0x1d   : > { %v4304_v0 = vld [vmem:[%s4301_s15 + $0x70] sm:$0xff]   ;;  %v4307_v1 = vld [vmem:[%s4301_s15 + $0x78] sm:$0xff]   ;;  %v4310_v2 = vld [vmem:[%s4301_s15 + $0x68] sm:$0xff]  }
  0x1e   : > { %v796_v3 = vrot.slane %v4304_v0, 1  ;;  %v798_v4 = vrot.slane %v4307_v1, 1  ;;  %v794_v5 = vrot.slane %v4310_v2, 1  ;;  %v4316_v6 = vld [vmem:[%s4301_s15 + $0x80] sm:$0xff]   ;;  %v598_v7 = vshll.u32 %v4310_v2, 16  ;;  %v4322_v10 = vld [vmem:[%s4301_s15 + $0x8] sm:$0xff]  }
  0x1f   : > { %v602_v8 = vshrl.u32 %v4310_v2, 16  ;;  %v606_v9 = vshll.u32 %v4304_v0, 16  ;;  %v610_v12 = vshrl.u32 %v4304_v0, 16  ;;  %v614_v13 = vshll.u32 %v4307_v1, 16  ;;  %v4335_v18 = vld [vmem:[%s4301_s15 + $0x10] sm:$0xff]   ;;  %v4345_v25 = vld [vmem:[%s4301_s15 + $0x18] sm:$0xff]  }
  0x20   : > { %v799_v11 = vsel %vm768_vm0, %v796_v3, %v798_v4  ;;  %v797_v14 = vsel %vm768_vm0, %v794_v5, %v796_v3  ;;  %v800_v15 = vrot.slane %v4316_v6, 1  ;;  %v4332_v16 = vrot.slane %v598_v7, 1  ;;  %v4358_v34 = vld [vmem:[%s4301_s15 + $0x20] sm:$0xff]   ;;  %v4364_v39 = vld [vmem:[%s4301_s15 + $0x88] sm:$0xff]   ;;  %v4378_v52 = vld [vmem:[%s4301_s15 + $0x90] sm:$0xff]  }
  0x21   : > { %852 = vrot.lane.b32.xlu0 %v799_v11, %s4198_s16  ;;  %v608_v17 = vrot.slane %v606_v9, 1  ;;  %850 = vrot.lane.b32.xlu1 %v797_v14, %s4198_s16  ;;  %v616_v19 = vrot.slane %v614_v13, 1  ;;  %v770_v20 = vrot.slane %v4322_v10, 1  ;;  %v772_v24 = vrot.slane %v4335_v18, 1  ;;  %v4390_v61 = vld [vmem:[%s4301_s15 + $0x28] sm:$0xff]   ;;  %v4399_v11 = vld [vmem:[%s4301_s15 + $0x30] sm:$0xff]  }
  0x22   : > { %v801_v21 = vsel %vm768_vm0, %v798_v4, %v800_v15  ;;  %v604_v22 = vor.u32 %v602_v8, %v4332_v16  ;;  %v510_v26 = vshll.u32 %v4335_v18, 16  ;;  %v514_v27 = vshrl.u32 %v4335_v18, 16 }
  0x23   : > { %v612_v23 = vor.u32 %v610_v12, %v608_v17  ;;  %v618_v28 = vshrl.u32 %v4307_v1, 16  ;;  %v622_v29 = vshll.u32 %v4316_v6, 16  ;;  %v773_v32 = vsel %vm768_vm0, %v770_v20, %v772_v24 }
  0x24   : > { %v609_v30 = vsel %vm493_vm1, %v604_v22, %v608_v17  ;;  %v518_v33 = vshll.u32 %v4345_v25, 16  ;;  %v512_v35 = vrot.slane %v510_v26, 1  ;;  %v522_v38 = vshrl.u32 %v4345_v25, 16 }
  0x25   : > { %v617_v31 = vsel %vm493_vm1, %v612_v23, %v616_v19  ;;  %854 = vrot.lane.b32.xlu1 %v801_v21, %s4198_s16  ;;  %740 = vrot.lane.b32.xlu0 %v609_v30, %s4199_s17  ;;  %v620_v36 = vor.u32 %v618_v28, %v616_v19  ;;  %v624_v37 = vrot.slane %v622_v29, 1  ;;  %v526_v41 = vshll.u32 %v4358_v34, 16  ;;  %v4409_v23 = vld [vmem:[%s4301_s15 + $0x98] sm:$0xff]  }
  0x26   : > { %v520_v40 = vrot.slane %v518_v33, 1  ;;  %v502_v42 = vshll.u32 %v4322_v10, 16  ;;  %v506_v43 = vshrl.u32 %v4322_v10, 16  ;;  %v516_v44 = vor.u32 %v514_v27, %v512_v35 }
  0x27   : > { %v528_v47 = vrot.slane %v526_v41, 1  ;;  %v625_v49 = vsel %vm493_vm1, %v620_v36, %v624_v37  ;;  %v630_v51 = vshll.u32 %v4364_v39, 16  ;;  %v774_v53 = vrot.slane %v4345_v25, 1 }
  0x28   : > { %v4369_v45 = vrot.slane %v502_v42, 1  ;;  %v524_v46 = vor.u32 %v522_v38, %v520_v40  ;;  %v521_v48 = vsel %vm493_vm1, %v516_v44, %v520_v40  ;;  %v776_v55 = vrot.slane %v4358_v34, 1  ;;  %v4435_v42 = vld [vmem:[%s4301_s15 + $0x60] sm:$0xff]  }
  0x29   : > { %742 = vrot.lane.b32.xlu0 %v617_v31, %s4199_s17  ;;  %826 = vrot.lane.b32.xlu1 %v773_v32, %s4198_s16  ;;  %v626_v56 = vshrl.u32 %v4316_v6, 16  ;;  %v632_v58 = vrot.slane %v630_v51, 1  ;;  %v634_v59 = vshrl.u32 %v4364_v39, 16  ;;  %v638_v60 = vshll.u32 %v4378_v52, 16  ;;  %v4420_v31 = vld [vmem:[%s4301_s15 + $0xa0] sm:$0xff]   ;;  %v4423_v32 = vld [vmem:[%s4301_s15 + $0x38] sm:$0xff]  }
  0x2a   : > { %v508_v50 = vor.u32 %v506_v43, %v4369_v45  ;;  %v529_v54 = vsel %vm493_vm1, %v524_v46, %v528_v47  ;;  %v775_v62 = vsel %vm768_vm0, %v772_v24, %v774_v53  ;;  %v777_v63 = vsel %vm768_vm0, %v774_v53, %v776_v55 }
  0x2b   : > { %v628_v3 = vor.u32 %v626_v56, %v624_v37  ;;  %v636_v4 = vor.u32 %v634_v59, %v632_v58  ;;  %v640_v7 = vrot.slane %v638_v60, 1  ;;  %v530_v8 = vshrl.u32 %v4358_v34, 16 }
  0x2c   : > { %v513_v57 = vsel %vm493_vm1, %v508_v50, %v512_v35  ;;  %v534_v9 = vshll.u32 %v4390_v61, 16  ;;  %v802_v13 = vrot.slane %v4364_v39, 1  ;;  %v538_v14 = vshrl.u32 %v4390_v61, 16 }
  0x2d   : > { %718 = vrot.lane.b32.xlu0 %v521_v48, %s4199_s17  ;;  %744 = vrot.lane.b32.xlu1 %v625_v49, %s4199_s17  ;;  %v633_v12 = vsel %vm493_vm1, %v628_v3, %v632_v58  ;;  %v641_v17 = vsel %vm493_vm1, %v636_v4, %v640_v7  ;;  %v532_v19 = vor.u32 %v530_v8, %v528_v47  ;;  %v542_v22 = vshll.u32 %v4399_v11, 16  ;;  %v4443_v47 = vld [vmem:[%s4301_s15 + $0x40] sm:$0xff]   ;;  %v4030_v8 = vld [vmem:[%s5782_s1 + $0x8] sm:$0x3f]  }
  0x2e   : > { %v536_v21 = vrot.slane %v534_v9, 1  ;;  %v803_v24 = vsel %vm768_vm0, %v800_v15, %v802_v13  ;;  %v804_v26 = vrot.slane %v4378_v52, 1  ;;  %v646_v30 = vshll.u32 %v4409_v23, 16  ;;  %3933 = vmatprep.subr.msk.bf16.mxu1 %vm1486_vm2, %v4030_v8  ;;  %3932 = vmatprep.subr.msk.bf16.mxu0 %vm1486_vm2, %v4030_v8 }
  0x2f   : > { %v544_v29 = vrot.slane %v542_v22, 1  ;;  %v778_v15 = vrot.slane %v4390_v61, 1  ;;  %v780_v33 = vrot.slane %v4399_v11, 1  ;;  %v642_v35 = vshrl.u32 %v4378_v52, 16 }
  0x30   : > { %v537_v27 = vsel %vm493_vm1, %v532_v19, %v536_v21  ;;  %v540_v28 = vor.u32 %v538_v14, %v536_v21  ;;  %v650_v36 = vshrl.u32 %v4409_v23, 16  ;;  %v805_v37 = vsel %vm768_vm0, %v802_v13, %v804_v26  ;;  %v4475_v19 = vld [vmem:[%s4301_s15 + $0xb0] sm:$0xff]  }
  0x31   : > { %720 = vrot.lane.b32.xlu0 %v529_v54, %s4199_s17  ;;  %716 = vrot.lane.b32.xlu1 %v513_v57, %s4199_s17  ;;  %v648_v40 = vrot.slane %v646_v30, 1  ;;  %v654_v41 = vshll.u32 %v4420_v31, 16  ;;  %v779_v43 = vsel %vm768_vm0, %v776_v55, %v778_v15  ;;  %v546_v44 = vshrl.u32 %v4399_v11, 16 }
  0x32   : > { %v545_v38 = vsel %vm493_vm1, %v540_v28, %v544_v29  ;;  %v550_v46 = vshll.u32 %v4423_v32, 16  ;;  %v781_v48 = vsel %vm768_vm0, %v778_v15, %v780_v33  ;;  %v644_v49 = vor.u32 %v642_v35, %v640_v7 }
  0x33   : > { %v652_v50 = vor.u32 %v650_v36, %v648_v40  ;;  %v656_v51 = vrot.slane %v654_v41, 1  ;;  %v806_v53 = vrot.slane %v4409_v23, 1  ;;  %v590_v54 = vshll.u32 %v4435_v42, 16 }
  0x34   : > { %v548_v55 = vor.u32 %v546_v44, %v544_v29  ;;  %v552_v56 = vrot.slane %v550_v46, 1  ;;  %v554_v57 = vshrl.u32 %v4423_v32, 16  ;;  %v558_v58 = vshll.u32 %v4443_v47, 16 }
  0x35   : > { %828 = vrot.lane.b32.xlu0 %v775_v62, %s4198_s16  ;;  %830 = vrot.lane.b32.xlu1 %v777_v63, %s4198_s16  ;;  %v649_v59 = vsel %vm493_vm1, %v644_v49, %v648_v40  ;;  %v657_v60 = vsel %vm493_vm1, %v652_v50, %v656_v51  ;;  %v4457_v62 = vld [vmem:[%s4301_s15 + $0xa8] sm:$0xff]   ;;  %v4460_v63 = vld [vmem:[%s4301_s15] sm:$0xff]   ;;  %v808_v3 = vrot.slane %v4420_v31, 1  ;;  %v4463_v4 = vrot.slane %v590_v54, 1 }
  0x36   : > { %v594_v7 = vshrl.u32 %v4435_v42, 16  ;;  %v807_v9 = vsel %vm768_vm0, %v804_v26, %v806_v53  ;;  %v556_v13 = vor.u32 %v554_v57, %v552_v56  ;;  %v560_v14 = vrot.slane %v558_v58, 1  ;;  %v4497_v40 = vld [vmem:[%s4301_s15 + $0x48] sm:$0xff]  }
  0x37   : > { %v495_v22 = vshrl.u32 %v4460_v63, 16  ;;  %v1488_v29 = vsel %vm1486_vm2, %v4030_v8, 0  ;;  %v782_v30 = vrot.slane %v4423_v32, 1  ;;  %v784_v15 = vrot.slane %v4443_v47, 1 }
  0x38   : > { %v596_v21 = vor.u32 %v594_v7, %v4463_v4  ;;  %v658_v35 = vshrl.u32 %v4420_v31, 16  ;;  %v561_v36 = vsel %vm493_vm1, %v556_v13, %v560_v14  ;;  %3931 = vmatpush3.bf16.msra.mxu1 %v1488_v29  ;;  %3781 = vmatpush3.bf16.msra.mxu0 %v1488_v29  ;;  %v566_v54 = vshll.u32 %v4497_v40, 16 }
  0x39   : > { %746 = vrot.lane.b32.xlu0 %v633_v12, %s4199_s17  ;;  %748 = vrot.lane.b32.xlu1 %v641_v17, %s4199_s17  ;;  %v553_v12 = vsel %vm493_vm1, %v548_v55, %v552_v56  ;;  %v662_v17 = vshll.u32 %v4457_v62, 16  ;;  %v783_v44 = vsel %vm768_vm0, %v780_v33, %v782_v30  ;;  %v785_v46 = vsel %vm768_vm0, %v782_v30, %v784_v15 }
  0x3a   : > { %v4483_v26 = vsel %vm493_vm1, %v596_v21, %v4332_v16  ;;  %v666_v16 = vshrl.u32 %v4457_v62, 16  ;;  %v810_v33 = vrot.slane %v4457_v62, 1  ;;  %v570_v56 = vshrl.u32 %v4497_v40, 16  ;;  %v4047_v21 = vld [vmem:[%s5782_s1] sm:$0x3f]  }
  0x3b   : > { %v568_v58 = vrot.slane %v566_v54, 1  ;;  %v812_v7 = vrot.slane %v4475_v19, 1  ;;  %v4546_v29 = vsel %vm1486_vm2, %v4047_v21, 0  ;;  %3934 = vmatprep.subr.msk.bf16.mxu1 %vm1486_vm2, %v4047_v21 }
  0x3c   : > { %v811_v8 = vsel %vm768_vm0, %v808_v3, %v810_v33 }
  0x3d   : > { %856 = vrot.lane.b32.xlu0 %v803_v24, %s4198_s16  ;;  %722 = vrot.lane.b32.xlu1 %v537_v27, %s4199_s17  ;;  %v497_v24 = vshll.u32 %v4460_v63, 16  ;;  %v809_v27 = vsel %vm768_vm0, %v806_v53, %v808_v3  ;;  %v562_v53 = vshrl.u32 %v4443_v47, 16  ;;  %v786_v3 = vrot.slane %v4497_v40, 1 }
  0x3f   : > { %v499_v28 = vrot.slane %v497_v24, 1  ;;  %v564_v57 = vor.u32 %v562_v53, %v560_v14  ;;  %v4531_v14 = vld [vmem:[%s4301_s15 + $0xc0] sm:$0xff]   ;;  %v813_v24 = vsel %vm768_vm0, %v810_v33, %v812_v7 }
  0x41   : > { %858 = vrot.lane.b32.xlu0 %v805_v37, %s4198_s16  ;;  %724 = vrot.lane.b32.xlu1 %v545_v38, %s4199_s17  ;;  %v664_v37 = vrot.slane %v662_v17, 1  ;;  %v670_v38 = vshll.u32 %v4475_v19, 16  ;;  %v500_v41 = vor.u32 %v499_v28, %v495_v22  ;;  %v4048_v22 = vld [vmem:[%s5782_s1 + $0x10] sm:$0x3f]   ;;  %v674_v28 = vshrl.u32 %v4475_v19, 16 }
  0x42   : > { %v4549_v30 = vsel %vm1486_vm2, %v4048_v22, 0  ;;  %3935 = vmatprep.subr.msk.bf16.mxu0 %vm1486_vm2, %v4048_v22  ;;  %v792_v22 = vrot.slane %v4435_v42, 1 }
  0x43   : > { %v668_v49 = vor.u32 %v666_v16, %v664_v37  ;;  %v672_v50 = vrot.slane %v670_v38, 1  ;;  %v4555_v38 = vld [vmem:[%s4301_s15 + $0x58] sm:$0xff]  }
  0x44   : > { %v582_v54 = vshll.u32 %v4555_v38, 16  ;;  %v586_v33 = vshrl.u32 %v4555_v38, 16  ;;  %v790_v21 = vrot.slane %v4555_v38, 1 }
  0x45   : > { %832 = vrot.lane.b32.xlu0 %v779_v43, %s4198_s16  ;;  %834 = vrot.lane.b32.xlu1 %v781_v48, %s4198_s16  ;;  %v4501_v43 = vsel %vm493_vm1, %v500_v41, %v4369_v45  ;;  %v660_v48 = vor.u32 %v658_v35, %v656_v51  ;;  %v4512_v45 = vld [vmem:[%s4301_s15 + $0x50] sm:$0xff]   ;;  %v673_v51 = vsel %vm493_vm1, %v668_v49, %v672_v50 }
  0x46   : > { %v787_v41 = vsel %vm768_vm0, %v784_v15, %v786_v3  ;;  %v578_v53 = vshrl.u32 %v4512_v45, 16 }
  0x47   : > { %v665_v55 = vsel %vm493_vm1, %v660_v48, %v664_v37  ;;  %v686_v37 = vshll.u32 %v4531_v14, 16 }
  0x49   : > { %750 = vrot.lane.b32.xlu0 %v649_v59, %s4199_s17  ;;  %752 = vrot.lane.b32.xlu1 %v657_v60, %s4199_s17  ;;  %v574_v59 = vshll.u32 %v4512_v45, 16  ;;  %v4522_v60 = vld [vmem:[%s4301_s15 + $0xb8] sm:$0xff]   ;;  %v688_v49 = vrot.slane %v686_v37, 1 }
  0x4a   : > { %v678_v17 = vshll.u32 %v4522_v60, 16 }
  0x4b   : > { %v576_v13 = vrot.slane %v574_v59, 1 }
  0x4c   : > { %v680_v16 = vrot.slane %v678_v17, 1  ;;  %v4581_v17 = vld [vmem:[%s4301_s15 + $0xd0] sm:$0xff]  }
  0x4d   : > { %860 = vrot.lane.b32.xlu0 %v807_v9, %s4198_s16  ;;  %726 = vrot.lane.b32.xlu1 %v553_v12, %s4199_s17  ;;  %v569_v9 = vsel %vm493_vm1, %v564_v57, %v568_v58  ;;  %v572_v12 = vor.u32 %v570_v56, %v568_v58  ;;  %v4572_v57 = vld [vmem:[%s4301_s15 + $0xc8] sm:$0xff]   ;;  %v816_v58 = vrot.slane %v4531_v14, 1 }
  0x4f   : > { %v577_v35 = vsel %vm493_vm1, %v572_v12, %v576_v13  ;;  %v694_v12 = vshll.u32 %v4572_v57, 16 }
  0x51   : > { %862 = vrot.lane.b32.xlu0 %v809_v27, %s4198_s16  ;;  %728 = vrot.lane.b32.xlu1 %v561_v36, %s4199_s17  ;;  %v788_v27 = vrot.slane %v4512_v45, 1  ;;  %v682_v36 = vshrl.u32 %v4522_v60, 16 }
  0x53   : > { %v684_v48 = vor.u32 %v682_v36, %v680_v16  ;;  %v793_v36 = vsel %vm768_vm0, %v790_v21, %v792_v22 }
  0x55   : > { %836 = vrot.lane.b32.xlu0 %v783_v44, %s4198_s16  ;;  %838 = vrot.lane.b32.xlu1 %v785_v46, %s4198_s16  ;;  %v789_v44 = vsel %vm768_vm0, %v786_v3, %v788_v27  ;;  %v676_v46 = vor.u32 %v674_v28, %v672_v50  ;;  %v689_v56 = vsel %vm493_vm1, %v684_v48, %v688_v49  ;;  %v696_v3 = vrot.slane %v694_v12, 1  ;;  %v2683_v12 = vld [vmem:[%s5784_s3 + $0x20] sm:$0xff] }
  0x56   : > { %v580_v50 = vor.u32 %v578_v53, %v576_v13  ;;  %v698_v28 = vshrl.u32 %v4572_v57, 16  ;;  %v820_v48 = vrot.slane %v4581_v17, 1  ;;  %v4200_v53 = vmov 0  }
  0x57   : > { %v681_v15 = vsel %vm493_vm1, %v676_v46, %v680_v16  ;;  %v791_v16 = vsel %vm768_vm0, %v788_v27, %v790_v21  ;;  %v818_v46 = vrot.slane %v4572_v57, 1  ;;  %4002 = vset.pattern.permute.xlu1 %v4200_v53  ;;  %4001 = vset.pattern.permute.xlu0 %v4200_v53 }
  0x58   : > { %v700_v37 = vor.u32 %v698_v28, %v696_v3 }
  0x59   : > { %754 = vrot.lane.b32.xlu0 %v665_v55, %s4199_s17  ;;  %756 = vrot.lane.b32.xlu1 %v673_v51, %s4199_s17  ;;  %v814_v55 = vrot.slane %v4522_v60, 1  ;;  %v584_v51 = vrot.slane %v582_v54, 1  ;;  %v819_v27 = vsel %vm768_vm0, %v816_v58, %v818_v46  ;;  %v795_v54 = vsel %vm768_vm0, %v792_v22, %v794_v5  ;;  %v2685_v22 = vld [vmem:[%s5784_s3 + $0x30] sm:$0xff] }
  0x5b   : > { %v815_v59 = vsel %vm768_vm0, %v812_v7, %v814_v55  ;;  %v817_v13 = vsel %vm768_vm0, %v814_v55, %v816_v58  ;;  %v821_v55 = vsel %vm768_vm0, %v818_v46, %v820_v48 }
  0x5d   : > { %864 = vrot.lane.b32.xlu0 %v811_v8, %s4198_s16  ;;  %730 = vrot.lane.b32.xlu1 %v569_v9, %s4199_s17  ;;  %v585_v8 = vsel %vm493_vm1, %v580_v50, %v584_v51  ;;  %v588_v9 = vor.u32 %v586_v33, %v584_v51  ;;  %v769_v33 = vrot.slane %v4460_v63, 1 }
  0x5f   : > { %v593_v7 = vsel %vm493_vm1, %v588_v9, %v4463_v4  ;;  %v771_v50 = vsel %vm768_vm0, %v769_v33, %v770_v20  ;;  %v2680_v20 = vld [vmem:[%s5784_s3 + $0x8] sm:$0xff] }
  0x61   : > { %866 = vrot.lane.b32.xlu0 %v813_v24, %s4198_s16  ;;  %732 = vrot.lane.b32.xlu1 %v577_v35, %s4199_s17  ;;  %v690_v24 = vshrl.u32 %v4531_v14, 16  ;;  %v702_v35 = vshll.u32 %v4581_v17, 16 }
  0x63   : > { %v692_v42 = vor.u32 %v690_v24, %v688_v49  ;;  %v4051_v49 = vld [vmem:[%s4301_s15 + $0xd8] ss:$0 sps:$4 sm:$0xff]  }
  0x64   : > { %v822_v58 = vrot.slane %v4051_v49, 1  ;;  %v2686_v24 = vld [vmem:[%s5784_s3 + $0x38] sm:$0xff] }
  0x65   : > { %840 = vrot.lane.b32.xlu0 %v787_v41, %s4198_s16  ;;  %842 = vrot.lane.b32.xlu1 %v789_v44, %s4198_s16  ;;  %v704_v41 = vrot.slane %v702_v35, 1  ;;  %v697_v4 = vsel %vm493_vm1, %v692_v42, %v696_v3  ;;  %v2687_v42 = vld [vmem:[%s5784_s3 + $0x40] sm:$0xff] }
  0x66   : > { %v823_v63 = vsel %vm768_vm0, %v820_v48, %v822_v58  ;;  %v2689_v48 = vld [vmem:[%s5784_s3 + $0x50] sm:$0xff] }
  0x67   : > { %v705_v44 = vsel %vm493_vm1, %v700_v37, %v704_v41  ;;  %v2688_v37 = vld [vmem:[%s5784_s3 + $0x48] sm:$0xff] }
  0x69   : > { %758 = vrot.lane.b32.xlu0 %v681_v15, %s4199_s17  ;;  %760 = vrot.lane.b32.xlu1 %v689_v56, %s4199_s17  ;;  %v706_v15 = vshrl.u32 %v4581_v17, 16  ;;  %v710_v56 = vshll.u32 %v4051_v49, 16  ;;  %v2690_v49 = vld [vmem:[%s5784_s3 + $0x58] sm:$0xff] }
  0x6b   : > { %v712_v51 = vrot.slane %v710_v56, 1  ;;  %v2691_v56 = vld [vmem:[%s5784_s3 + $0x60] sm:$0xff] }
  0x6d   : > { %868 = vrot.lane.b32.xlu0 %v815_v59, %s4198_s16  ;;  %734 = vrot.lane.b32.xlu1 %v585_v8, %s4199_s17  ;;  %v2679_v59 = vld [vmem:[%s5784_s3] sm:$0xff]  ;;  %v2682_v8 = vld [vmem:[%s5784_s3 + $0x18] sm:$0xff] }
  0x71   : > { %870 = vrot.lane.b32.xlu0 %v817_v13, %s4198_s16  ;;  %736 = vrot.lane.b32.xlu1 %v593_v7, %s4199_s17  ;;  %v2684_v13 = vld [vmem:[%s5784_s3 + $0x28] sm:$0xff] }
  0x75   : > { %844 = vrot.lane.b32.xlu0 %v791_v16, %s4198_s16  ;;  %846 = vrot.lane.b32.xlu1 %v793_v36, %s4198_s16 }
  0x79   : > { %762 = vrot.lane.b32.xlu0 %v697_v4, %s4199_s17  ;;  %764 = vrot.lane.b32.xlu1 %v705_v44, %s4199_s17 }
  0x7d   : > { %872 = vrot.lane.b32.xlu0 %v819_v27, %s4198_s16  ;;  %738 = vrot.lane.b32.xlu1 %v4483_v26, %s4199_s17  ;;  %v708_v26 = vor.u32 %v706_v15, %v704_v41 }
  0x7f   : > { %v713_v5 = vsel %vm493_vm1, %v708_v26, %v712_v51 }
  0x81   : > { %874 = vrot.lane.b32.xlu0 %v821_v55, %s4198_s16  ;;  %848 = vrot.lane.b32.xlu1 %v795_v54, %s4198_s16 }
  0x85   : > { %714 = vrot.lane.b32.xlu0 %v4501_v43, %s4199_s17  ;;  %824 = vrot.lane.b32.xlu1 %v771_v50, %s4198_s16  ;;  %v2681_v43 = vld [vmem:[%s5784_s3 + $0x10] sm:$0xff]  ;;  %v2692_v50 = vld [vmem:[%s5784_s3 + $0x68] sm:$0xff] }
  0x89   : > { %766 = vrot.lane.b32.xlu0 %v713_v5, %s4199_s17  ;;  %876 = vrot.lane.b32.xlu1 %v823_v63, %s4198_s16  ;;  %s272_s16 = scalar_lea.vmem [#allocation3], %s5692_s20 }
  0x8a   : > { %s3315_s17 = sshll.u32 %s272_s16, 4  ;;  %s5704_s17 = int_to_ptr.vmem [resolvable:$true] %s3315_s17 }
  0x8d   : > { %2734 = vperm.xlu1 %4002, %v2680_v20   ;;  %2729 = vperm.xlu0 %4001, %v2679_v59   ;;  %v2693_v59 = vld [vmem:[%s5784_s3 + $0x70] sm:$0xff] }
  0x91   : > { %2739 = vperm.xlu1 %4002, %v2681_v43   ;;  %2744 = vperm.xlu0 %4001, %v2682_v8   ;;  %v2694_v43 = vld [vmem:[%s5784_s3 + $0x78] sm:$0xff] }
  0x93   : > { %v853_v9 = vpop.permute.xlu0 %852  ;;  %v851_v21 = vpop.permute.xlu1 %850 }
  0x95   : > { %2749 = vperm.xlu1 %4002, %v2683_v12   ;;  %2754 = vperm.xlu0 %4001, %v2684_v13  }
  0x97   : > { %v855_v7 = vpop.permute.xlu1 %854  ;;  %v741_v3 = vpop.permute.xlu0 %740 }
  0x98   : > { %v906_v28 = vsel %vm878_vm3, %v4310_v2, %v741_v3 }
  0x99   : > { %v961_v35 = vsel %vm933_vm4, %v906_v28, %v851_v21  ;;  %2759 = vperm.xlu1 %4002, %v2685_v22   ;;  %2764 = vperm.xlu0 %4001, %v2686_v24  }
  0x9a   : > { %v3521_v16 = vcombine.low %v961_v35, %v961_v35  ;;  %v3522_v36 = vcombine.high %v961_v35, %v961_v35 }
  0x9b   : > { %v743_v41 = vpop.permute.xlu0 %742  ;;  %v827_v4 = vpop.permute.xlu1 %826 }
  0x9c   : > { %1204 = vst.msk [vmem:[#allocation2 + $0x68] sm:$0xf] %vm1177_vm5, %v3521_v16  ;;  %1205 = vst.msk [vmem:[#allocation2 + $0x6c] sm:$0xf] %vm1177_vm5, %v3522_v36  ;;  %v908_v2 = vsel %vm878_vm3, %v4304_v0, %v743_v41  ;;  %v2695_v16 = vld [vmem:[%s5784_s3 + $0x80] sm:$0xff] }
  0x9d   : > { %v963_v44 = vsel %vm933_vm4, %v908_v2, %v853_v9  ;;  %2769 = vperm.xlu1 %4002, %v2687_v42   ;;  %2774 = vperm.xlu0 %4001, %v2688_v37  }
  0x9e   : > { %v3523_v46 = vcombine.low %v963_v44, %v963_v44  ;;  %v3524_v27 = vcombine.high %v963_v44, %v963_v44 }
  0x9f   : > { %v719_v53 = vpop.permute.xlu0 %718  ;;  %v745_v54 = vpop.permute.xlu1 %744 }
  0xa0   : > { %1206 = vst.msk [vmem:[#allocation2 + $0x70] sm:$0xf] %vm1177_vm5, %v3523_v46  ;;  %1207 = vst.msk [vmem:[#allocation2 + $0x74] sm:$0xf] %vm1177_vm5, %v3524_v27  ;;  %v910_v0 = vsel %vm878_vm3, %v4307_v1, %v745_v54  ;;  %v2697_v46 = vld [vmem:[%s5784_s3 + $0x90] sm:$0xff] }
  0xa1   : > { %v965_v55 = vsel %vm933_vm4, %v910_v0, %v855_v7  ;;  %2779 = vperm.xlu1 %4002, %v2689_v48   ;;  %2784 = vperm.xlu0 %4001, %v2690_v49  }
  0xa2   : > { %v3525_v33 = vcombine.low %v965_v55, %v965_v55  ;;  %v3526_v15 = vcombine.high %v965_v55, %v965_v55 }
  0xa3   : > { %v721_v26 = vpop.permute.xlu0 %720  ;;  %v717_v51 = vpop.permute.xlu1 %716  ;;  %v4688_v20 = vld [vmem:[#allocation2 + $0x6c] sm:$0xf] }
  0xa4   : > { %1208 = vst.msk [vmem:[#allocation2 + $0x78] sm:$0xf] %vm1177_vm5, %v3525_v33  ;;  %1209 = vst.msk [vmem:[#allocation2 + $0x7c] sm:$0xf] %vm1177_vm5, %v3526_v15  ;;  %v882_v1 = vsel %vm878_vm3, %v4322_v10, %v717_v51  ;;  %v884_v10 = vsel %vm878_vm3, %v4335_v18, %v719_v53  ;;  %v886_v8 = vsel %vm878_vm3, %v4345_v25, %v721_v26  ;;  %v2698_v53 = vld [vmem:[%s5784_s3 + $0x98] sm:$0xff]  ;;  %v2699_v15 = vld [vmem:[%s5784_s3 + $0xa0] sm:$0xff] }
  0xa5   : > { %v937_v58 = vsel %vm933_vm4, %v882_v1, %v827_v4  ;;  %2789 = vperm.xlu1 %4002, %v2691_v56   ;;  %2794 = vperm.xlu0 %4001, %v2692_v50   ;;  %v2696_v4 = vld [vmem:[%s5784_s3 + $0x88] sm:$0xff] }
  0xa6   : > { %v3497_v5 = vcombine.low %v937_v58, %v937_v58  ;;  %v3498_v63 = vcombine.high %v937_v58, %v937_v58 }
  0xa7   : > { %v829_v9 = vpop.permute.xlu0 %828  ;;  %v831_v12 = vpop.permute.xlu1 %830  ;;  %v4700_v13 = vld [vmem:[#allocation2 + $0x70] sm:$0xf]  ;;  %v4702_v21 = vld [vmem:[#allocation2 + $0x74] sm:$0xf] }
  0xa8   : > { %1180 = vst.msk [vmem:[#allocation2 + $0x8] sm:$0xf] %vm1177_vm5, %v3497_v5  ;;  %1181 = vst.msk [vmem:[#allocation2 + $0xc] sm:$0xf] %vm1177_vm5, %v3498_v63  ;;  %v939_v22 = vsel %vm933_vm4, %v884_v10, %v829_v9  ;;  %v941_v24 = vsel %vm933_vm4, %v886_v8, %v831_v12  ;;  %v3563_v18 = vcombine.low %v4688_v20, %v4700_v13  ;;  %v2701_v9 = vld [vmem:[%s5784_s3 + $0xb0] sm:$0xff] }
  0xa9   : > { %v3614_v25 = vcombine.low %v4700_v13, %v4702_v21  ;;  %v3499_v7 = vcombine.low %v939_v22, %v939_v22  ;;  %v3500_v3 = vcombine.high %v939_v22, %v939_v22  ;;  %v3501_v28 = vcombine.low %v941_v24, %v941_v24  ;;  %2799 = vperm.xlu1 %4002, %v2693_v59  }
  0xaa   : > { %v3502_v35 = vcombine.high %v941_v24, %v941_v24  ;;  %3806 = vmatprep.mubr.msk.bf16.mxu1 %vm1413_vm6, %v3563_v18  ;;  %2804 = vperm.xlu0 %4001, %v2694_v43  }
  0xab   : > { %1182 = vst.msk [vmem:[#allocation2 + $0x10] sm:$0xf] %vm1177_vm5, %v3499_v7  ;;  %1183 = vst.msk [vmem:[#allocation2 + $0x14] sm:$0xf] %vm1177_vm5, %v3500_v3  ;;  %v4720_v36 = vld [vmem:[#allocation2 + $0x78] sm:$0xf]  ;;  %v747_v42 = vpop.permute.xlu0 %746  ;;  %v749_v37 = vpop.permute.xlu1 %748 }
  0xac   : > { %1184 = vst.msk [vmem:[#allocation2 + $0x18] sm:$0xf] %vm1177_vm5, %v3501_v28  ;;  %1185 = vst.msk [vmem:[#allocation2 + $0x1c] sm:$0xf] %vm1177_vm5, %v3502_v35  ;;  %v4722_v41 = vld [vmem:[#allocation2 + $0x7c] sm:$0xf]  ;;  %v3564_v2 = vcombine.low %v4702_v21, %v4720_v36  ;;  %v912_v27 = vsel %vm878_vm3, %v4316_v6, %v747_v42  ;;  %v914_v26 = vsel %vm878_vm3, %v4364_v39, %v749_v37 }
  0xad   : > { %v3615_v44 = vcombine.low %v4720_v36, %v4722_v41  ;;  %2809 = vperm.xlu1 %4002, %v2695_v16   ;;  %v2700_v6 = vld [vmem:[%s5784_s3 + $0xa8] sm:$0xff]  ;;  %v2702_v7 = vld [vmem:[%s5784_s3 + $0xb8] sm:$0xff] }
  0xae   : > { %3807 = vmatmul.mubr.msk.bf16.vlgmr.msra.gmra.mxu1 %vm1413_vm6, %v3564_v2  ;;  %2814 = vperm.xlu0 %4001, %v2696_v4  }
  0xaf   : > { %v857_v48 = vpop.permute.xlu0 %856  ;;  %v723_v49 = vpop.permute.xlu1 %722  ;;  %3831 = vmatpush3.bf16.msra.mxu1 %v4546_v29  ;;  %v4742_v33 = vld [vmem:[#allocation2 + $0xc] sm:$0xf] }
  0xb0   : > { %v967_v54 = vsel %vm933_vm4, %v912_v27, %v857_v48  ;;  %v888_v12 = vsel %vm878_vm3, %v4358_v34, %v723_v49  ;;  %v2704_v27 = vld [vmem:[%s5784_s3 + $0xc8] sm:$0xff]  ;;  %v2705_v49 = vld [vmem:[%s5784_s3 + $0xd0] sm:$0xff] }
  0xb1   : > { %v3527_v0 = vcombine.low %v967_v54, %v967_v54  ;;  %v3528_v55 = vcombine.high %v967_v54, %v967_v54  ;;  %2819 = vperm.xlu1 %4002, %v2697_v46  }
  0xb2   : > { %v4750_v29 = vld [vmem:[#allocation2 + $0x10] sm:$0xf]  ;;  %v4752_v56 = vld [vmem:[#allocation2 + $0x14] sm:$0xf]  ;;  %2824 = vperm.xlu0 %4001, %v2698_v53  }
  0xb3   : > { %v4754_v50 = vld [vmem:[#allocation2 + $0x18] sm:$0xf]  ;;  %1210 = vst.msk [vmem:[#allocation2 + $0x80] sm:$0xf] %vm1177_vm5, %v3527_v0  ;;  %1211 = vst.msk [vmem:[#allocation2 + $0x84] sm:$0xf] %vm1177_vm5, %v3528_v55  ;;  %v859_v51 = vpop.permute.xlu0 %858  ;;  %v725_v1 = vpop.permute.xlu1 %724  ;;  %v3551_v58 = vcombine.low %v4742_v33, %v4750_v29  ;;  %v3602_v63 = vcombine.low %v4750_v29, %v4752_v56 }
  0xb4   : > { %v3552_v5 = vcombine.low %v4752_v56, %v4754_v50  ;;  %v4766_v59 = vld [vmem:[#allocation2 + $0x1c] sm:$0xf]  ;;  %v969_v43 = vsel %vm933_vm4, %v914_v26, %v859_v51  ;;  %v890_v22 = vsel %vm878_vm3, %v4390_v61, %v725_v1  ;;  %v2703_v61 = vld [vmem:[%s5784_s3 + $0xc0] sm:$0xff] }
  0xb5   : > { %v3603_v39 = vcombine.low %v4754_v50, %v4766_v59  ;;  %v3529_v10 = vcombine.low %v969_v43, %v969_v43  ;;  %v3530_v8 = vcombine.high %v969_v43, %v969_v43  ;;  %3782 = vmatprep.mubr.msk.bf16.mxu0 %vm1413_vm6, %v3551_v58  ;;  %2829 = vperm.xlu1 %4002, %v2699_v15   ;;  %v2706_v26 = vld [vmem:[%s5784_s3 + $0xd8] sm:$0xff]  ;;  %v2708_v43 = vld [vmem:[%s5784_s3 + $0xe8] sm:$0xff] }
  0xb6   : > { %3783 = vmatmul.mubr.msk.bf16.vlgmr.msra.gmra.mxu0 %vm1413_vm6, %v3552_v5  ;;  %2834 = vperm.xlu0 %4001, %v2700_v6  }
  0xb7   : > { %1212 = vst.msk [vmem:[#allocation2 + $0x88] sm:$0xf] %vm1177_vm5, %v3529_v10  ;;  %1213 = vst.msk [vmem:[#allocation2 + $0x8c] sm:$0xf] %vm1177_vm5, %v3530_v8  ;;  %v833_v24 = vpop.permute.xlu0 %832  ;;  %v835_v18 = vpop.permute.xlu1 %834  ;;  %3881 = vmatpush3.bf16.msra.mxu0 %v4549_v30 }
  0xb8   : > { %v943_v3 = vsel %vm933_vm4, %v888_v12, %v833_v24  ;;  %v945_v28 = vsel %vm933_vm4, %v890_v22, %v835_v18 }
  0xb9   : > { %v3503_v34 = vcombine.low %v943_v3, %v943_v3  ;;  %v3504_v35 = vcombine.high %v943_v3, %v943_v3  ;;  %v3505_v16 = vcombine.low %v945_v28, %v945_v28  ;;  %v3506_v42 = vcombine.high %v945_v28, %v945_v28  ;;  %2839 = vperm.xlu1 %4002, %v2701_v9  }
  0xba   : > { %v4791_v37 = vld [vmem:[#allocation2 + $0x80] sm:$0xf]  ;;  %v4793_v30 = vld [vmem:[#allocation2 + $0x84] sm:$0xf]  ;;  %2844 = vperm.xlu0 %4001, %v2702_v7  }
  0xbb   : > { %1186 = vst.msk [vmem:[#allocation2 + $0x20] sm:$0xf] %vm1177_vm5, %v3503_v34  ;;  %1187 = vst.msk [vmem:[#allocation2 + $0x24] sm:$0xf] %vm1177_vm5, %v3504_v35  ;;  %v751_v4 = vpop.permute.xlu0 %750  ;;  %v753_v2 = vpop.permute.xlu1 %752  ;;  %v3565_v46 = vcombine.low %v4722_v41, %v4791_v37 }
  0xbc   : > { %1188 = vst.msk [vmem:[#allocation2 + $0x28] sm:$0xf] %vm1177_vm5, %v3505_v16  ;;  %1189 = vst.msk [vmem:[#allocation2 + $0x2c] sm:$0xf] %vm1177_vm5, %v3506_v42  ;;  %v916_v0 = vsel %vm878_vm3, %v4378_v52, %v751_v4  ;;  %v2707_v52 = vld [vmem:[%s5784_s3 + $0xe0] sm:$0xff]  ;;  %v918_v12 = vsel %vm878_vm3, %v4409_v23, %v753_v2  ;;  %v2709_v42 = vld [vmem:[%s5784_s3 + $0xf0] sm:$0xff] }
  0xbd   : > { %3810 = vmatprep.mubr.msk.bf16.mxu1 %vm1413_vm6, %v3565_v46  ;;  %2849 = vperm.xlu1 %4002, %v2703_v61  }
  0xbe   : > { %v4810_v53 = vld [vmem:[#allocation2 + $0x88] sm:$0xf]  ;;  %v4812_v54 = vld [vmem:[#allocation2 + $0x8c] sm:$0xf]  ;;  %2854 = vperm.xlu0 %4001, %v2704_v27   ;;  %v2710_v27 = vld [vmem:[%s5784_s3 + $0xf8] sm:$0xff] }
  0xbf   : > { %v861_v55 = vpop.permute.xlu0 %860  ;;  %v727_v15 = vpop.permute.xlu1 %726  ;;  %v3566_v6 = vcombine.low %v4793_v30, %v4810_v53  ;;  %v5792_v13 = vcombine.low %v4810_v53, %v4812_v54 }
  0xc0   : > { %v971_v1 = vsel %vm933_vm4, %v916_v0, %v861_v55  ;;  %v892_v61 = vsel %vm878_vm3, %v4399_v11, %v727_v15 }
  0xc1   : > { %v3531_v58 = vcombine.low %v971_v1, %v971_v1  ;;  %v3532_v5 = vcombine.high %v971_v1, %v971_v1  ;;  %3811 = vmatmul.mubr.msk.bf16.gmra.mxu1 %vm1413_vm6, %v3566_v6  ;;  %2859 = vperm.xlu1 %4002, %v2705_v49  }
  0xc2   : > { %v4831_v10 = vld [vmem:[#allocation2 + $0x20] sm:$0xf]  ;;  %v4833_v8 = vld [vmem:[#allocation2 + $0x24] sm:$0xf]  ;;  %2864 = vperm.xlu0 %4001, %v2706_v26  }
  0xc3   : > { %v4835_v9 = vld [vmem:[#allocation2 + $0x28] sm:$0xf]  ;;  %1214 = vst.msk [vmem:[#allocation2 + $0x90] sm:$0xf] %vm1177_vm5, %v3531_v58  ;;  %1215 = vst.msk [vmem:[#allocation2 + $0x94] sm:$0xf] %vm1177_vm5, %v3532_v5  ;;  %v863_v22 = vpop.permute.xlu0 %862  ;;  %v729_v24 = vpop.permute.xlu1 %728  ;;  %v3553_v18 = vcombine.low %v4766_v59, %v4831_v10  ;;  %v3604_v28 = vcombine.low %v4831_v10, %v4833_v8 }
  0xc4   : > { %v3554_v7 = vcombine.low %v4833_v8, %v4835_v9  ;;  %v4845_v3 = vld [vmem:[#allocation2 + $0x2c] sm:$0xf]  ;;  %v973_v34 = vsel %vm933_vm4, %v918_v12, %v863_v22  ;;  %v894_v4 = vsel %vm878_vm3, %v4423_v32, %v729_v24  ;;  %v2711_v26 = vld [vmem:[%s5784_s3 + $0x100] sm:$0xff]  ;;  %v2713_v22 = vld [vmem:[%s5784_s3 + $0x110] sm:$0xff] }
  0xc5   : > { %v3605_v23 = vcombine.low %v4835_v9, %v4845_v3  ;;  %v3533_v35 = vcombine.low %v973_v34, %v973_v34  ;;  %v3534_v16 = vcombine.high %v973_v34, %v973_v34  ;;  %3786 = vmatprep.mubr.msk.bf16.mxu0 %vm1413_vm6, %v3553_v18  ;;  %2869 = vperm.xlu1 %4002, %v2707_v52  }
  0xc6   : > { %3787 = vmatmul.mubr.msk.bf16.gmra.mxu0 %vm1413_vm6, %v3554_v7  ;;  %2874 = vperm.xlu0 %4001, %v2708_v43   ;;  %v2712_v43 = vld [vmem:[%s5784_s3 + $0x108] sm:$0xff] }
  0xc7   : > { %1216 = vst.msk [vmem:[#allocation2 + $0x98] sm:$0xf] %vm1177_vm5, %v3533_v35  ;;  %1217 = vst.msk [vmem:[#allocation2 + $0x9c] sm:$0xf] %vm1177_vm5, %v3534_v16  ;;  %v837_v2 = vpop.permute.xlu0 %836  ;;  %v839_v46 = vpop.permute.xlu1 %838 }
  0xc8   : > { %v947_v49 = vsel %vm933_vm4, %v892_v61, %v837_v2  ;;  %v949_v0 = vsel %vm933_vm4, %v894_v4, %v839_v46 }
  0xc9   : > { %v3507_v55 = vcombine.low %v947_v49, %v947_v49  ;;  %v3508_v6 = vcombine.high %v947_v49, %v947_v49  ;;  %v3509_v11 = vcombine.low %v949_v0, %v949_v0  ;;  %v3510_v15 = vcombine.high %v949_v0, %v949_v0  ;;  %2879 = vperm.xlu1 %4002, %v2709_v42   ;;  %v2714_v42 = vld [vmem:[%s5784_s3 + $0x118] sm:$0xff] }
  0xca   : > { %v4871_v32 = vld [vmem:[#allocation2 + $0x90] sm:$0xf]  ;;  %v4873_v1 = vld [vmem:[#allocation2 + $0x94] sm:$0xf]  ;;  %2884 = vperm.xlu0 %4001, %v2710_v27  }
  0xcb   : > { %1190 = vst.msk [vmem:[#allocation2 + $0x30] sm:$0xf] %vm1177_vm5, %v3507_v55  ;;  %1191 = vst.msk [vmem:[#allocation2 + $0x34] sm:$0xf] %vm1177_vm5, %v3508_v6  ;;  %v755_v58 = vpop.permute.xlu0 %754  ;;  %v757_v5 = vpop.permute.xlu1 %756  ;;  %v3567_v52 = vcombine.low %v4812_v54, %v4871_v32 }
  0xcc   : > { %1192 = vst.msk [vmem:[#allocation2 + $0x38] sm:$0xf] %vm1177_vm5, %v3509_v11  ;;  %1193 = vst.msk [vmem:[#allocation2 + $0x3c] sm:$0xf] %vm1177_vm5, %v3510_v15  ;;  %v920_v7 = vsel %vm878_vm3, %v4420_v31, %v755_v58  ;;  %v2715_v31 = vld [vmem:[%s5784_s3 + $0x120] sm:$0xff]  ;;  %v922_v55 = vsel %vm878_vm3, %v4457_v62, %v757_v5 }
  0xcd   : > { %3814 = vmatprep.mubr.msk.bf16.mxu1 %vm1413_vm6, %v3567_v52  ;;  %2889 = vperm.xlu1 %4002, %v2711_v26   ;;  %v2716_v52 = vld [vmem:[%s5784_s3 + $0x128] sm:$0xff] }
  0xce   : > { %v4890_v24 = vld [vmem:[#allocation2 + $0x98] sm:$0xf]  ;;  %v4892_v18 = vld [vmem:[#allocation2 + $0x9c] sm:$0xf]  ;;  %2894 = vperm.xlu0 %4001, %v2712_v43  }
  0xcf   : > { %v865_v34 = vpop.permute.xlu0 %864  ;;  %v731_v35 = vpop.permute.xlu1 %730  ;;  %v3568_v16 = vcombine.low %v4873_v1, %v4890_v24  ;;  %v5794_v41 = vcombine.low %v4890_v24, %v4892_v18 }
  0xd0   : > { %v975_v4 = vsel %vm933_vm4, %v920_v7, %v865_v34  ;;  %v896_v7 = vsel %vm878_vm3, %v4443_v47, %v731_v35 }
  0xd1   : > { %v3535_v2 = vcombine.low %v975_v4, %v975_v4  ;;  %v3536_v46 = vcombine.high %v975_v4, %v975_v4  ;;  %3815 = vmatmul.mubr.msk.bf16.gmra.mxu1 %vm1413_vm6, %v3568_v16  ;;  %2899 = vperm.xlu1 %4002, %v2713_v22   ;;  %v2717_v22 = vld [vmem:[%s5784_s3 + $0x130] sm:$0xff]  ;;  %v2718_v4 = vld [vmem:[%s5784_s3 + $0x138] sm:$0xff] }
  0xd2   : > { %v4908_v27 = vld [vmem:[#allocation2 + $0x30] sm:$0xf]  ;;  %v4910_v49 = vld [vmem:[#allocation2 + $0x34] sm:$0xf]  ;;  %2904 = vperm.xlu0 %4001, %v2714_v42  }
  0xd3   : > { %v4912_v0 = vld [vmem:[#allocation2 + $0x38] sm:$0xf]  ;;  %1218 = vst.msk [vmem:[#allocation2 + $0xa0] sm:$0xf] %vm1177_vm5, %v3535_v2  ;;  %1219 = vst.msk [vmem:[#allocation2 + $0xa4] sm:$0xf] %vm1177_vm5, %v3536_v46  ;;  %v867_v6 = vpop.permute.xlu0 %866  ;;  %v733_v11 = vpop.permute.xlu1 %732  ;;  %v3555_v15 = vcombine.low %v4845_v3, %v4908_v27  ;;  %v3606_v58 = vcombine.low %v4908_v27, %v4910_v49 }
  0xd4   : > { %v3556_v26 = vcombine.low %v4910_v49, %v4912_v0  ;;  %v977_v62 = vsel %vm933_vm4, %v922_v55, %v867_v6  ;;  %v898_v34 = vsel %vm878_vm3, %v4497_v40, %v733_v11  ;;  %v2719_v6 = vld [vmem:[%s5784_s3 + $0x140] sm:$0xff]  ;;  %v4072_v3 = vld [vmem:[#allocation2 + $0x68] sm:$0xff]   ;;  %v4073_v27 = vld [vmem:[#allocation2 + $0x70] sm:$0xff]  }
  0xd5   : > { %v3537_v5 = vcombine.low %v977_v62, %v977_v62  ;;  %v3538_v43 = vcombine.high %v977_v62, %v977_v62  ;;  %3790 = vmatprep.mubr.msk.bf16.mxu0 %vm1413_vm6, %v3555_v15  ;;  %2909 = vperm.xlu1 %4002, %v2715_v31   ;;  %v2720_v62 = vld [vmem:[%s5784_s3 + $0x148] sm:$0xff]  ;;  %v4075_v49 = vld [vmem:[#allocation2 + $0x78] sm:$0xff]  }
  0xd6   : > { %3791 = vmatmul.mubr.msk.bf16.gmra.mxu0 %vm1413_vm6, %v3556_v26  ;;  %2914 = vperm.xlu0 %4001, %v2716_v52  }
  0xd7   : > { %1220 = vst.msk [vmem:[#allocation2 + $0xa8] sm:$0xf] %vm1177_vm5, %v3537_v5  ;;  %1221 = vst.msk [vmem:[#allocation2 + $0xac] sm:$0xf] %vm1177_vm5, %v3538_v43  ;;  %v841_v16 = vpop.permute.xlu0 %840  ;;  %v843_v42 = vpop.permute.xlu1 %842  ;;  %v2721_v43 = vld [vmem:[%s5784_s3 + $0x150] sm:$0xff] }
  0xd8   : > { %v951_v2 = vsel %vm933_vm4, %v896_v7, %v841_v16  ;;  %v953_v46 = vsel %vm933_vm4, %v898_v34, %v843_v42 }
  0xd9   : > { %v3511_v31 = vcombine.low %v951_v2, %v951_v2  ;;  %v3512_v55 = vcombine.high %v951_v2, %v951_v2  ;;  %v3513_v47 = vcombine.low %v953_v46, %v953_v46  ;;  %v3514_v35 = vcombine.high %v953_v46, %v953_v46  ;;  %2919 = vperm.xlu1 %4002, %v2717_v22   ;;  %v2722_v2 = vld [vmem:[%s5784_s3 + $0x158] sm:$0xff] }
  0xda   : > { %v4947_v40 = vld [vmem:[#allocation2 + $0xa0] sm:$0xf]  ;;  %v4949_v11 = vld [vmem:[#allocation2 + $0xa4] sm:$0xf]  ;;  %2924 = vperm.xlu0 %4001, %v2718_v4  }
  0xdb   : > { %1194 = vst.msk [vmem:[#allocation2 + $0x40] sm:$0xf] %vm1177_vm5, %v3511_v31  ;;  %1195 = vst.msk [vmem:[#allocation2 + $0x44] sm:$0xf] %vm1177_vm5, %v3512_v55  ;;  %v759_v15 = vpop.permute.xlu0 %758  ;;  %v761_v26 = vpop.permute.xlu1 %760  ;;  %v3569_v52 = vcombine.low %v4892_v18, %v4947_v40  ;;  %v4080_v21 = vld [vmem:[#allocation2 + $0xa0] sm:$0xff]  }
  0xdc   : > { %1196 = vst.msk [vmem:[#allocation2 + $0x48] sm:$0xf] %vm1177_vm5, %v3513_v47  ;;  %1197 = vst.msk [vmem:[#allocation2 + $0x4c] sm:$0xf] %vm1177_vm5, %v3514_v35  ;;  %v924_v34 = vsel %vm878_vm3, %v4475_v19, %v759_v15  ;;  %v4981_v35 = vld [vmem:[#allocation2 + $0x3c] sm:$0xf] }
  0xdd   : > { %3818 = vmatprep.mubr.msk.bf16.mxu1 %vm1413_vm6, %v3569_v52  ;;  %2929 = vperm.xlu1 %4002, %v2719_v6   ;;  %v2723_v19 = vld [vmem:[%s5784_s3 + $0x160] sm:$0xff]  ;;  %v3607_v50 = vcombine.low %v4912_v0, %v4981_v35 }
  0xde   : > { %v4966_v22 = vld [vmem:[#allocation2 + $0xa8] sm:$0xf]  ;;  %v4968_v7 = vld [vmem:[#allocation2 + $0xac] sm:$0xf]  ;;  %2934 = vperm.xlu0 %4001, %v2720_v62   ;;  %v926_v62 = vsel %vm878_vm3, %v4522_v60, %v761_v26  ;;  %v2725_v26 = vld [vmem:[%s5784_s3 + $0x170] sm:$0xff] }
  0xdf   : > { %v869_v16 = vpop.permute.xlu0 %868  ;;  %v735_v42 = vpop.permute.xlu1 %734  ;;  %v3570_v4 = vcombine.low %v4949_v11, %v4966_v22  ;;  %v4081_v36 = vld [vmem:[#allocation2 + $0xa8] sm:$0xff]   ;;  %v5796_v53 = vcombine.low %v4966_v22, %v4968_v7 }
  0xe0   : > { %v979_v31 = vsel %vm933_vm4, %v924_v34, %v869_v16 }
  0xe1   : > { %v3539_v55 = vcombine.low %v979_v31, %v979_v31  ;;  %v3540_v47 = vcombine.high %v979_v31, %v979_v31  ;;  %3819 = vmatmul.mubr.msk.bf16.gmra.mxu1 %vm1413_vm6, %v3570_v4  ;;  %2939 = vperm.xlu1 %4002, %v2721_v43   ;;  %v2724_v31 = vld [vmem:[%s5784_s3 + $0x168] sm:$0xff] }
  0xe2   : > { %v4986_v6 = vld [vmem:[#allocation2 + $0x40] sm:$0xf]  ;;  %v4988_v15 = vld [vmem:[#allocation2 + $0x44] sm:$0xf]  ;;  %2944 = vperm.xlu0 %4001, %v2722_v2  }
  0xe3   : > { %v4990_v52 = vld [vmem:[#allocation2 + $0x48] sm:$0xf]  ;;  %1222 = vst.msk [vmem:[#allocation2 + $0xb0] sm:$0xf] %vm1177_vm5, %v3539_v55  ;;  %1223 = vst.msk [vmem:[#allocation2 + $0xb4] sm:$0xf] %vm1177_vm5, %v3540_v47  ;;  %v871_v34 = vpop.permute.xlu0 %870  ;;  %v737_v43 = vpop.permute.xlu1 %736  ;;  %v3557_v16 = vcombine.low %v4981_v35, %v4986_v6  ;;  %v900_v55 = vsel %vm878_vm3, %v4512_v45, %v735_v42 }
  0xe4   : > { %v3558_v4 = vcombine.low %v4988_v15, %v4990_v52  ;;  %v981_v2 = vsel %vm933_vm4, %v926_v62, %v871_v34  ;;  %v902_v47 = vsel %vm878_vm3, %v4555_v38, %v737_v43  ;;  %v4067_v29 = vld [vmem:[#allocation2 + $0x40] sm:$0xff]   ;;  %v4068_v56 = vld [vmem:[#allocation2 + $0x48] sm:$0xff]   ;;  %v4078_v35 = vld [vmem:[#allocation2 + $0x90] sm:$0xff]  }
  0xe5   : > { %v3541_v46 = vcombine.low %v981_v2, %v981_v2  ;;  %v3542_v60 = vcombine.high %v981_v2, %v981_v2  ;;  %3794 = vmatprep.mubr.msk.bf16.mxu0 %vm1413_vm6, %v3557_v16  ;;  %2949 = vperm.xlu1 %4002, %v2723_v19   ;;  %v2726_v19 = vld [vmem:[%s5784_s3 + $0x178] sm:$0xff] }
  0xe6   : > { %3795 = vmatmul.mubr.msk.bf16.gmra.mxu0 %vm1413_vm6, %v3558_v4  ;;  %2954 = vperm.xlu0 %4001, %v2724_v31  }
  0xe7   : > { %1224 = vst.msk [vmem:[#allocation2 + $0xb8] sm:$0xf] %vm1177_vm5, %v3541_v46  ;;  %1225 = vst.msk [vmem:[#allocation2 + $0xbc] sm:$0xf] %vm1177_vm5, %v3542_v60  ;;  %v845_v62 = vpop.permute.xlu0 %844  ;;  %v847_v34 = vpop.permute.xlu1 %846 }
  0xe8   : > { %v955_v16 = vsel %vm933_vm4, %v900_v55, %v845_v62  ;;  %v957_v4 = vsel %vm933_vm4, %v902_v47, %v847_v34 }
  0xe9   : > { %v3515_v31 = vcombine.low %v955_v16, %v955_v16  ;;  %v3516_v2 = vcombine.high %v955_v16, %v955_v16  ;;  %v3517_v45 = vcombine.low %v957_v4, %v957_v4  ;;  %v3518_v42 = vcombine.high %v957_v4, %v957_v4  ;;  %2959 = vperm.xlu1 %4002, %v2725_v26  }
  0xea   : > { %v5020_v46 = vld [vmem:[#allocation2 + $0xb0] sm:$0xf]  ;;  %v5022_v60 = vld [vmem:[#allocation2 + $0xb4] sm:$0xf]  ;;  %2964 = vperm.xlu0 %4001, %v2726_v19  }
  0xeb   : > { %1198 = vst.msk [vmem:[#allocation2 + $0x50] sm:$0xf] %vm1177_vm5, %v3515_v31  ;;  %1199 = vst.msk [vmem:[#allocation2 + $0x54] sm:$0xf] %vm1177_vm5, %v3516_v2  ;;  %v763_v38 = vpop.permute.xlu0 %762  ;;  %v765_v43 = vpop.permute.xlu1 %764  ;;  %v3571_v55 = vcombine.low %v4968_v7, %v5020_v46 }
  0xec   : > { %1200 = vst.msk [vmem:[#allocation2 + $0x58] sm:$0xf] %vm1177_vm5, %v3517_v45  ;;  %1201 = vst.msk [vmem:[#allocation2 + $0x5c] sm:$0xf] %vm1177_vm5, %v3518_v42  ;;  %v928_v34 = vsel %vm878_vm3, %v4531_v14, %v763_v38  ;;  %v930_v5 = vsel %vm878_vm3, %v4572_v57, %v765_v43 }
  0xed   : > { %3822 = vmatprep.mubr.msk.bf16.mxu1 %vm1413_vm6, %v3571_v55  ;;  %v5045_v55 = vld [vmem:[#allocation2 + $0x4c] sm:$0xf] }
  0xee   : > { %v5033_v47 = vld [vmem:[#allocation2 + $0xb8] sm:$0xf]  ;;  %v5035_v62 = vld [vmem:[#allocation2 + $0xbc] sm:$0xf]  ;;  %v3609_v10 = vcombine.low %v4990_v52, %v5045_v55 }
  0xef   : > { %v873_v19 = vpop.permute.xlu0 %872  ;;  %v739_v16 = vpop.permute.xlu1 %738  ;;  %v3572_v4 = vcombine.low %v5022_v60, %v5033_v47  ;;  %v5798_v18 = vcombine.low %v5033_v47, %v5035_v62 }
  0xf0   : > { %v983_v2 = vsel %vm933_vm4, %v928_v34, %v873_v19  ;;  %v4087_v34 = vld [vmem:[%s4301_s15 + $0x60] sm:$0xff]  }
  0xf1   : > { %v3543_v45 = vcombine.low %v983_v2, %v983_v2  ;;  %v3544_v42 = vcombine.high %v983_v2, %v983_v2  ;;  %3823 = vmatmul.mubr.msk.bf16.gmra.mxu1 %vm1413_vm6, %v3572_v4  ;;  %v904_v19 = vsel %vm878_vm3, %v4087_v34, %v739_v16  ;;  %v4088_v34 = vld [vmem:[%s4301_s15] sm:$0xff]   ;;  %s3937_s15 = smul.u32 384, %s4295_s11  ;;  %s4090_s11 = scalar_lea.vmem %s5704_s17, 16 }
  0xf2   : > { %v5047_v26 = vld [vmem:[#allocation2 + $0x50] sm:$0xf]  ;;  %v5049_v14 = vld [vmem:[#allocation2 + $0x54] sm:$0xf]  ;;  %p4091_p12 = scmp.ne.s32.totalorder %s5704_s17, %s4090_s11 }
  0xf3   : > { %v5051_v38 = vld [vmem:[#allocation2 + $0x58] sm:$0xf]  ;;  %1226 = vst.msk [vmem:[#allocation2 + $0xc0] sm:$0xf] %vm1177_vm5, %v3543_v45  ;;  %1227 = vst.msk [vmem:[#allocation2 + $0xc4] sm:$0xf] %vm1177_vm5, %v3544_v42  ;;  %v875_v2 = vpop.permute.xlu0 %874  ;;  %v849_v4 = vpop.permute.xlu1 %848  ;;  %v3559_v31 = vcombine.low %v5045_v55, %v5047_v26  ;;  %v3610_v8 = vcombine.low %v5047_v26, %v5049_v14  ;;  %s5316_s18 = scalar_lea.vmem %s5785_s4, %s3937_s15 }
  0xf4   : > { %v3560_v61 = vcombine.low %v5049_v14, %v5051_v38  ;;  %v985_v12 = vsel %vm933_vm4, %v930_v5, %v875_v2  ;;  %v959_v57 = vsel %vm933_vm4, %v904_v19, %v849_v4  ;;  %v4069_v59 = vld [vmem:[#allocation2 + $0x50] sm:$0xff]   ;;  %p4092_p13 = pnand %p4091_p12, %p4278_p4  ;;  %s4094_s15 = sshll.u32 %s4201_s19, 4  ;;  %s4095_s15 = int_to_ptr.vmem [resolvable:$false] %s4094_s15 }
  0xf5   : > { %v3545_v43 = vcombine.low %v985_v12, %v985_v12  ;;  %v3546_v45 = vcombine.high %v985_v12, %v985_v12  ;;  %v3519_v51 = vcombine.low %v959_v57, %v959_v57  ;;  %v3520_v42 = vcombine.high %v959_v57, %v959_v57  ;;  %3798 = vmatprep.mubr.msk.bf16.mxu0 %vm1413_vm6, %v3559_v31  ;;  %s4096_s8 = scalar_lea.vmem %s4095_s15, 32  ;;  %p4097_p1 = scmp.lt.s32.totalorder %s5704_s17, %s4095_s15 }
  0xf6   : > { %3799 = vmatmul.mubr.msk.bf16.gmra.mxu0 %vm1413_vm6, %v3560_v61  ;;  %p4093_p0 = pneg %p4092_p13  ;;  %p4098_p2 = scmp.lt.s32.totalorder %s4096_s8, %s4090_s11 }
  0xf7   : > { %1228 = vst.msk [vmem:[#allocation2 + $0xc8] sm:$0xf] %vm1177_vm5, %v3545_v43  ;;  %1229 = vst.msk [vmem:[#allocation2 + $0xcc] sm:$0xf] %vm1177_vm5, %v3546_v45  ;;  %v715_v16 = vpop.permute.xlu0 %714  ;;  %v825_v5 = vpop.permute.xlu1 %824  ;;  %v5079_v45 = vld [vmem:[#allocation2 + $0x68] sm:$0xf] }
  0xf8   : > { %1202 = vst.msk [vmem:[#allocation2 + $0x60] sm:$0xf] %vm1177_vm5, %v3519_v51  ;;  %1203 = vst.msk [vmem:[#allocation2 + $0x64] sm:$0xf] %vm1177_vm5, %v3520_v42  ;;  %v880_v19 = vsel %vm878_vm3, %v4088_v34, %v715_v16  ;;  %v1255_v42 = vld [vmem:[#allocation2 + $0x5c] sm:$0xf]  ;;  %v3613_v0 = vcombine.low %v5079_v45, %v4688_v20  ;;  %v5791_v20 = vcombine.low %v4791_v37, %v4793_v30  ;;  %p4099_p3 = por %p4098_p2, %p4097_p1 }
  0xf9   : > { %v935_v12 = vsel %vm933_vm4, %v880_v19, %v825_v5  ;;  %v5795_v37 = vcombine.low %v4947_v40, %v4949_v11  ;;  %v4083_v30 = vld [vmem:[#allocation2 + $0xb8] sm:$0xff]  }
  0xfa   : > { %v3495_v2 = vcombine.low %v935_v12, %v935_v12  ;;  %v3496_v4 = vcombine.high %v935_v12, %v935_v12  ;;  %v1282_v31 = vld [vmem:[#allocation2 + $0xc0] sm:$0xf]  ;;  %p4100_p5 = pnand %p4099_p3, %p4093_p0 }
  0xfb   : > { %v3573_v61 = vcombine.low %v5035_v62, %v1282_v31  ;;  %v767_v57 = vpop.permute.xlu0 %766  ;;  %v877_v43 = vpop.permute.xlu1 %876  ;;  %v4084_v54 = vld [vmem:[#allocation2 + $0xc0] sm:$0xff]  }
  0xfc   : > { %1178 = vst.msk [vmem:[#allocation2] sm:$0xf] %vm1177_vm5, %v3495_v2  ;;  %1179 = vst.msk [vmem:[#allocation2 + $0x4] sm:$0xf] %vm1177_vm5, %v3496_v4  ;;  %v932_v51 = vsel %vm878_vm3, %v4581_v17, %v767_v57  ;;  %v4061_v17 = vld [vmem:[#allocation2 + $0x18] sm:$0xff]  }
  0xfd   : > { %3826 = vmatprep.mubr.msk.bf16.mxu1 %vm1413_vm6, %v3573_v61  ;;  %v987_v16 = vsel %vm933_vm4, %v932_v51, %v877_v43  ;;  %v1234_v4 = vld [vmem:[#allocation2 + $0x8] sm:$0xf]  ;;  %v4063_v43 = vld [vmem:[#allocation2 + $0x20] sm:$0xff]  }
  0xfe   : > { %v4060_v34 = vld [vmem:[#allocation2 + $0xc4] sm:$0xff]   ;;  %v3547_v19 = vcombine.low %v987_v16, %v987_v16  ;;  %v3548_v12 = vcombine.high %v987_v16, %v987_v16  ;;  %v3601_v57 = vcombine.low %v1234_v4, %v4742_v33  ;;  %v4065_v16 = vld [vmem:[#allocation2 + $0x30] sm:$0xff]   ;;  %v4066_v33 = vld [vmem:[#allocation2 + $0x38] sm:$0xff]  }
  0xff   : > { %v1256_v5 = vld [vmem:[#allocation2 + $0x60] sm:$0xf]  ;;  %v1257_v48 = vld [vmem:[#allocation2 + $0x64] sm:$0xf]  ;;  %3827 = vmatmul.mubr.msk.bf16.gmra.mxu1 %vm1413_vm6, %v4060_v34  ;;  %v4064_v51 = vld [vmem:[#allocation2 + $0x28] sm:$0xff]  }
 0x100   : > { %v3561_v31 = vcombine.low %v1255_v42, %v1256_v5  ;;  %v3562_v2 = vcombine.low %v1257_v48, %v5079_v45  ;;  %1230 = vst.msk [vmem:[#allocation2 + $0xd0] sm:$0xf] %vm1177_vm5, %v3547_v19  ;;  %1231 = vst.msk [vmem:[#allocation2 + $0xd4] sm:$0xf] %vm1177_vm5, %v3548_v12  ;;  %v4071_v9 = vld [vmem:[#allocation2 + $0x60] sm:$0xff]  }
 0x102   : > { %3802 = vmatprep.mubr.msk.bf16.mxu0 %vm1413_vm6, %v3561_v31 }
 0x103   : > { %3803 = vmatmul.mubr.msk.bf16.gmra.mxu0 %vm1413_vm6, %v3562_v2  ;;  %v4062_v61 = vld [vmem:[#allocation2] sm:$0xff]  }
 0x104   : > { %3882 = vmatprep.mubr.msk.bf16.mxu0 %vm1413_vm6, %v4061_v17  ;;  %3832 = vmatprep.mubr.msk.bf16.mxu1 %vm1413_vm6, %v4062_v61 }
 0x107   : > { %3833 = vmatmul.mubr.msk.bf16.vlgmr.msra.gmra.mxu1 %vm1413_vm6, %v3601_v57  ;;  %v4086_v24 = vld [vmem:[#allocation2 + $0xd0] sm:$0xff]  }
 0x108   : > { %3836 = vmatprep.mubr.msk.bf16.mxu1 %vm1413_vm6, %v3602_v63  ;;  %v3608_v63 = vcombine.low %v4986_v6, %v4988_v15  ;;  %v4079_v6 = vld [vmem:[#allocation2 + $0x98] sm:$0xff]  }
 0x10b   : > { %3883 = vmatmul.mubr.msk.bf16.vlgmr.msra.gmra.mxu0 %vm1413_vm6, %v4063_v43 }
 0x10c   : > { %3886 = vmatprep.mubr.msk.bf16.mxu0 %vm1413_vm6, %v4064_v51  ;;  %v5246_v51 = vpop.permute.xlu1 %2734 }
 0x10f   : > { %3837 = vmatmul.mubr.msk.bf16.gmra.mxu1 %vm1413_vm6, %v3603_v39  ;;  %v4070_v39 = vld [vmem:[#allocation2 + $0x58] sm:$0xff]  }
 0x110   : > { %3840 = vmatprep.mubr.msk.bf16.mxu1 %vm1413_vm6, %v3604_v28  ;;  %v3611_v28 = vcombine.low %v5051_v38, %v1255_v42 }
 0x113   : > { %3887 = vmatmul.mubr.msk.bf16.gmra.mxu0 %vm1413_vm6, %v4065_v16 }
 0x114   : > { %3890 = vmatprep.mubr.msk.bf16.mxu0 %vm1413_vm6, %v4066_v33 }
 0x117   : > { %3841 = vmatmul.mubr.msk.bf16.gmra.mxu1 %vm1413_vm6, %v3605_v23  ;;  %v3612_v23 = vcombine.low %v1256_v5, %v1257_v48  ;;  %v4077_v48 = vld [vmem:[#allocation2 + $0x88] sm:$0xff]  }
 0x118   : > { %3844 = vmatprep.mubr.msk.bf16.mxu1 %vm1413_vm6, %v3606_v58  ;;  %v4076_v58 = vld [vmem:[#allocation2 + $0x80] sm:$0xff]  }
 0x11b   : > { %3891 = vmatmul.mubr.msk.bf16.gmra.mxu0 %vm1413_vm6, %v4067_v29  ;;  %v2730_v29 = vpop.permute.xlu0 %2729 }
 0x11c   : > { %3894 = vmatprep.mubr.msk.bf16.mxu0 %vm1413_vm6, %v4068_v56 }
 0x11f   : > { %3845 = vmatmul.mubr.msk.bf16.gmra.mxu1 %vm1413_vm6, %v3607_v50 }
 0x120   : > { %3848 = vmatprep.mubr.msk.bf16.mxu1 %vm1413_vm6, %v3608_v63  ;;  %v2740_v63 = vpop.permute.xlu1 %2739 }
 0x123   : > { %3895 = vmatmul.mubr.msk.bf16.gmra.mxu0 %vm1413_vm6, %v4069_v59 }
 0x124   : > { %3898 = vmatprep.mubr.msk.bf16.mxu0 %vm1413_vm6, %v4070_v39  ;;  %v2745_v39 = vpop.permute.xlu0 %2744 }
 0x127   : > { %3849 = vmatmul.mubr.msk.bf16.gmra.mxu1 %vm1413_vm6, %v3609_v10 }
 0x128   : > { %3852 = vmatprep.mubr.msk.bf16.mxu1 %vm1413_vm6, %v3610_v8 }
 0x12b   : > { %3899 = vmatmul.mubr.msk.bf16.gmra.mxu0 %vm1413_vm6, %v4071_v9 }
 0x12c   : > { %3902 = vmatprep.mubr.msk.bf16.mxu0 %vm1413_vm6, %v4072_v3  ;;  %v5264_v3 = vpop.permute.xlu1 %2749 }
 0x12f   : > { %3853 = vmatmul.mubr.msk.bf16.gmra.mxu1 %vm1413_vm6, %v3611_v28 }
 0x130   : > { %3856 = vmatprep.mubr.msk.bf16.mxu1 %vm1413_vm6, %v3612_v23  ;;  %v5268_v23 = vpop.permute.xlu0 %2754 }
 0x133   : > { %3903 = vmatmul.mubr.msk.bf16.gmra.mxu0 %vm1413_vm6, %v4073_v27 }
 0x134   : > { %3906 = vmatprep.mubr.msk.bf16.mxu0 %vm1413_vm6, %v4075_v49 }
 0x137   : > { %3857 = vmatmul.mubr.msk.bf16.gmra.mxu1 %vm1413_vm6, %v3613_v0  ;;  %v5274_v0 = vpop.permute.xlu1 %2759 }
 0x138   : > { %3860 = vmatprep.mubr.msk.bf16.mxu1 %vm1413_vm6, %v3614_v25  ;;  %v5793_v25 = vcombine.low %v4871_v32, %v4873_v1  ;;  %v5797_v32 = vcombine.low %v5020_v46, %v5022_v60  ;;  %v4085_v1 = vld [vmem:[#allocation2 + $0xc8] sm:$0xff]  }
 0x13b   : > { %3907 = vmatmul.mubr.msk.bf16.gmra.mxu0 %vm1413_vm6, %v4076_v58 }
 0x13c   : > { %3910 = vmatprep.mubr.msk.bf16.mxu0 %vm1413_vm6, %v4077_v48  ;;  %v5278_v48 = vpop.permute.xlu0 %2764 }
 0x13f   : > { %3861 = vmatmul.mubr.msk.bf16.gmra.mxu1 %vm1413_vm6, %v3615_v44  ;;  %v4082_v44 = vld [vmem:[#allocation2 + $0xb0] sm:$0xff]  }
 0x140   : > { %3864 = vmatprep.mubr.msk.bf16.mxu1 %vm1413_vm6, %v5791_v20 }
 0x143   : > { %3911 = vmatmul.mubr.msk.bf16.gmra.mxu0 %vm1413_vm6, %v4078_v35 }
 0x144   : > { %3914 = vmatprep.mubr.msk.bf16.mxu0 %vm1413_vm6, %v4079_v6 }
 0x147   : > { %3865 = vmatmul.mubr.msk.bf16.gmra.mxu1 %vm1413_vm6, %v5792_v13 }
 0x148   : > { %3868 = vmatprep.mubr.msk.bf16.mxu1 %vm1413_vm6, %v5793_v25 }
 0x14b   : > { %3915 = vmatmul.mubr.msk.bf16.gmra.mxu0 %vm1413_vm6, %v4080_v21  ;;  %v5288_v21 = vpop.permute.xlu1 %2769 }
 0x14c   : > { %3918 = vmatprep.mubr.msk.bf16.mxu0 %vm1413_vm6, %v4081_v36 }
 0x14f   : > { %3869 = vmatmul.mubr.msk.bf16.gmra.mxu1 %vm1413_vm6, %v5794_v41  ;;  %v5294_v41 = vpop.permute.xlu0 %2774 }
 0x150   : > { %3872 = vmatprep.mubr.msk.bf16.mxu1 %vm1413_vm6, %v5795_v37 }
 0x153   : > { %3919 = vmatmul.mubr.msk.bf16.gmra.mxu0 %vm1413_vm6, %v4082_v44 }
 0x154   : > { %3922 = vmatprep.mubr.msk.bf16.mxu0 %vm1413_vm6, %v4083_v30 }
 0x157   : > { %3873 = vmatmul.mubr.msk.bf16.gmra.mxu1 %vm1413_vm6, %v5796_v53 }
 0x158   : > { %3876 = vmatprep.mubr.msk.bf16.mxu1 %vm1413_vm6, %v5797_v32 }
 0x15b   : > { %3923 = vmatmul.mubr.msk.bf16.gmra.mxu0 %vm1413_vm6, %v4084_v54  ;;  %v5303_v54 = vpop.permute.xlu1 %2779 }
 0x15c   : > { %3926 = vmatprep.mubr.msk.bf16.mxu0 %vm1413_vm6, %v4085_v1 }
 0x15f   : > { %3877 = vmatmul.mubr.msk.bf16.gmra.mxu1 %vm1413_vm6, %v5798_v18 }
 0x163   : > { %3927 = vmatmul.mubr.msk.bf16.gmra.mxu0 %vm1413_vm6, %v4086_v24  ;;  %v5308_v24 = vld [vmem:[%s5783_s2] ss:$0 sm:$0xff] }
 0x16e   : > { %v5194_v40 = vpop.f32.mrf.mxu1 }
 0x170   : > { %v5196_v11 = vpop.f32.mrf.mxu1 }
 0x172   : > { %v5198_v7 = vpop.f32.mrf.mxu1 }
 0x174   : > { %v5202_v52 = vpop.f32.mrf.mxu1 }
 0x176   : > { %v3784_v22 = vpop.f32.mrf.mxu0 }
 0x178   : > { %v5200_v15 = vpop.f32.mrf.mxu0 }
 0x17a   : > { %v5204_v46 = vpop.f32.mrf.mxu0 }
 0x17c   : > { %v5208_v26 = vpop.f32.mrf.mxu0 }
 0x181   : > { %v5206_v60 = vpop.f32.mrf.mxu1 }
 0x183   : > { %v5210_v47 = vpop.f32.mrf.mxu1 }
 0x185   : > { %v5214_v55 = vpop.f32.mrf.mxu1 }
 0x186   : > { %v5212_v62 = vpop.f32.mrf.mxu0 }
 0x187   : > { %v5218_v38 = vpop.f32.mrf.mxu1 }
 0x188   : > { %v5216_v14 = vpop.f32.mrf.mxu0 }
 0x18a   : > { %v5220_v45 = vpop.f32.mrf.mxu0 }
 0x18c   : > { %v5224_v5 = vpop.f32.mrf.mxu0 }
 0x191   : > { %v5222_v42 = vpop.f32.mrf.mxu1 }
 0x193   : > { %v5226_v34 = vpop.f32.mrf.mxu1 }
 0x195   : > { %v5230_v12 = vpop.f32.mrf.mxu1 }
 0x196   : > { %v5228_v19 = vpop.f32.mrf.mxu0  ;;  %5799 = vst [vmem:[#allocation9_spill] sm:$0xff] %v5230_v12 }
 0x197   : > { %v5234_v2 = vpop.f32.mrf.mxu1 }
 0x198   : > { %v5232_v31 = vpop.f32.mrf.mxu0  ;;  %5800 = vst [vmem:[#allocation10_spill] sm:$0xff] %v5234_v2 }
 0x19a   : > { %v5236_v17 = vpop.f32.mrf.mxu0 }
 0x19c   : > { %v5240_v61 = vpop.f32.mrf.mxu0 }
 0x1a1   : > { %v5238_v4 = vpop.f32.mrf.mxu1 }
 0x1a2   : > { %5801 = vst [vmem:[#allocation11_spill] sm:$0xff] %v5238_v4 }
 0x1a3   : > { %v5242_v57 = vpop.f32.mrf.mxu1 }
 0x1a4   : > { %5802 = vst [vmem:[#allocation12_spill] sm:$0xff] %v5242_v57 }
 0x1a5   : > { %v5248_v16 = vpop.f32.mrf.mxu1 }
 0x1a6   : > { %v5244_v43 = vpop.f32.mrf.mxu0  ;;  %5803 = vst [vmem:[#allocation13_spill] sm:$0xff] %v5248_v16 }
 0x1a7   : > { %v5252_v56 = vpop.f32.mrf.mxu1 }
 0x1a8   : > { %v5250_v33 = vpop.f32.mrf.mxu0  ;;  %5804 = vst [vmem:[#allocation14_spill] sm:$0xff] %v5252_v56 }
 0x1aa   : > { %v5254_v50 = vpop.f32.mrf.mxu0 }
 0x1ac   : > { %v5258_v10 = vpop.f32.mrf.mxu0 }
 0x1b1   : > { %v5256_v59 = vpop.f32.mrf.mxu1 }
 0x1b2   : > { %5805 = vst [vmem:[#allocation15_spill] sm:$0xff] %v5256_v59 }
 0x1b3   : > { %v5260_v8 = vpop.f32.mrf.mxu1 }
 0x1b4   : > { %5806 = vst [vmem:[#allocation16_spill] sm:$0xff] %v5260_v8 }
 0x1b5   : > { %v5270_v27 = vpop.f32.mrf.mxu1 }
 0x1b6   : > { %v5262_v9 = vpop.f32.mrf.mxu0  ;;  %5807 = vst [vmem:[#allocation17_spill] sm:$0xff] %v5270_v27 }
 0x1b7   : > { %v5276_v58 = vpop.f32.mrf.mxu1 }
 0x1b8   : > { %v5266_v28 = vpop.f32.mrf.mxu0  ;;  %5808 = vst [vmem:[#allocation18_spill] sm:$0xff] %v5276_v58 }
 0x1ba   : > { %v5272_v49 = vpop.f32.mrf.mxu0 }
 0x1bc   : > { %v5280_v35 = vpop.f32.mrf.mxu0 }
 0x1bf   : > { %v5282_v20 = vpop.f32.mrf.mxu1 }
 0x1c0   : > { %5809 = vst [vmem:[#allocation19_spill] sm:$0xff] %v5282_v20 }
 0x1c1   : > { %v5286_v13 = vpop.f32.mrf.mxu1 }
 0x1c2   : > { %5810 = vst [vmem:[#allocation20_spill] sm:$0xff] %v5286_v13 }
 0x1c3   : > { %v5284_v6 = vpop.f32.mrf.mxu0  ;;  %v5292_v36 = vpop.f32.mrf.mxu1 }
 0x1c4   : > { %5811 = vst [vmem:[#allocation21_spill] sm:$0xff] %v5292_v36  ;;  %v5310_v36 = vpop.permute.xlu0 %2784 }
 0x1c5   : > { %v5290_v25 = vpop.f32.mrf.mxu0  ;;  %v5298_v37 = vpop.f32.mrf.mxu1 }
 0x1c6   : > { %5812 = vst [vmem:[#allocation22_spill] sm:$0xff] %v5298_v37 }
 0x1c7   : > { %v5296_v44 = vpop.f32.mrf.mxu0  ;;  %v3834_v53 = vpop.f32.mrf.mxu1 }
 0x1c8   : > { %v1868_v32 = vadd.f32 %v3834_v53, %v3784_v22  ;;  %v5326_v4 = vpop.permute.xlu0 %2794 }
 0x1c9   : > { %v5300_v30 = vpop.f32.mrf.mxu0  ;;  %v1859_v18 = vpop.f32.mrf.mxu1 }
 0x1ca   : > { %v1860_v20 = vadd.f32 %v1859_v18, %v5200_v15 }
 0x1cb   : > { %v3884_v1 = vpop.f32.mrf.mxu0  ;;  %v3835_v53 = vpop.f32.mrf.mxu1 }
 0x1cc   : > { %v2528_v13 = vadd.f32 %v3884_v1, %v1868_v32  ;;  %v1871_v27 = vadd.f32 %v3835_v53, %v5204_v46  ;;  %v5320_v32 = vpop.permute.xlu1 %2789 }
 0x1cd   : > { %v2335_v22 = vpop.f32.mrf.mxu0  ;;  %v1862_v59 = vpop.f32.mrf.mxu1 }
 0x1ce   : > { %v2583_v37 = vadd.f32 %v5308_v24, %v2528_v13  ;;  %v2526_v58 = vadd.f32 %v2335_v22, %v1860_v20  ;;  %v1863_v56 = vadd.f32 %v1862_v59, %v5208_v26 }
 0x1cf   : > { %v3885_v8 = vpop.f32.mrf.mxu0  ;;  %v3838_v57 = vpop.f32.mrf.mxu1 }
 0x1d0   : > { %2632 = vst.msk [vmem:[%s5316_s18 + $0x10] sm:$0xff] %vm2629_vm7, %v2583_v37  ;;  %v2969_v15 = vmul.f32 %v2740_v63, %v2583_v37  ;;  %v2581_v1 = vadd.f32 %v5308_v24, %v2526_v58  ;;  %v2529_v18 = vadd.f32 %v3885_v8, %v1871_v27  ;;  %v1884_v53 = vadd.f32 %v3838_v57, %v5212_v62  ;;  %v5336_v12 = vpop.permute.xlu1 %2799 }
 0x1d1   : > { %v2338_v16 = vpop.f32.mrf.mxu0  ;;  %v1875_v37 = vpop.f32.mrf.mxu1 }
 0x1d2   : > { %v3119_v20 = vmul.f32 %v2969_v15, %v2969_v15  ;;  %2630 = vst.msk [vmem:[%s5316_s18] sm:$0xff] %vm2629_vm7, %v2581_v1  ;;  %v2584_v46 = vadd.f32 %v5308_v24, %v2529_v18  ;;  %v2967_v13 = vmul.f32 %v2730_v29, %v2581_v1  ;;  %v2527_v22 = vadd.f32 %v2338_v16, %v1863_v56 }
 0x1d3   : > { %v3888_v63 = vpop.f32.mrf.mxu0  ;;  %v1876_v27 = vadd.f32 %v1875_v37, %v5216_v14  ;;  %v3839_v2 = vpop.f32.mrf.mxu1  ;;  %v3018_v29 = vsel %vm2629_vm7, %v2969_v15, 0.0 }
 0x1d4   : > { %2633 = vst.msk [vmem:[%s5316_s18 + $0x18] sm:$0xff] %vm2629_vm7, %v2584_v46  ;;  %v2970_v8 = vmul.f32 %v2745_v39, %v2584_v46  ;;  %v2582_v26 = vadd.f32 %v5308_v24, %v2527_v22  ;;  %v2532_v59 = vadd.f32 %v3888_v63, %v1884_v53  ;;  %v3168_v16 = vsel %vm2629_vm7, %v3119_v20, 0.0  ;;  %v5345_v46 = vpop.permute.xlu0 %2804 }
 0x1d5   : > { %v2351_v58 = vpop.f32.mrf.mxu0  ;;  %v1887_v62 = vadd.f32 %v3839_v2, %v5220_v45  ;;  %v3117_v57 = vmul.f32 %v2967_v13, %v2967_v13  ;;  %v1878_v18 = vpop.f32.mrf.mxu1  ;;  %v3015_v22 = vsel %vm2629_vm7, %v2967_v13, 0.0 }
 0x1d6   : > { %2631 = vst.msk [vmem:[%s5316_s18 + $0x8] sm:$0xff] %vm2629_vm7, %v2582_v26  ;;  %v2968_v56 = vmul.f32 %v5246_v51, %v2582_v26  ;;  %v2587_v39 = vadd.f32 %v5308_v24, %v2532_v59  ;;  %v2530_v1 = vadd.f32 %v2351_v58, %v1876_v27  ;;  %v3120_v15 = vmul.f32 %v2970_v8, %v2970_v8 }
 0x1d7   : > { %v3889_v14 = vpop.f32.mrf.mxu0  ;;  %v1879_v20 = vadd.f32 %v1878_v18, %v5224_v5  ;;  %v3842_v26 = vpop.f32.mrf.mxu1  ;;  %v3165_v5 = vsel %vm2629_vm7, %v3117_v57, 0.0 }
 0x1d8   : > { %v2533_v53 = vadd.f32 %v3889_v14, %v1887_v62  ;;  %v3016_v45 = vsel %vm2629_vm7, %v2968_v56, 0.0  ;;  %v3118_v2 = vmul.f32 %v2968_v56, %v2968_v56  ;;  %2636 = vst.msk [vmem:[%s5316_s18 + $0x30] sm:$0xff] %vm2629_vm7, %v2587_v39  ;;  %v2973_v51 = vmul.f32 %v5274_v0, %v2587_v39  ;;  %v5361_v14 = vpop.permute.xlu1 %2809 }
 0x1d9   : > { %v2585_v63 = vadd.f32 %v5308_v24, %v2530_v1  ;;  %v2354_v37 = vpop.f32.mrf.mxu0  ;;  %v3017_v59 = vadd.f32 %v3016_v45, %v3015_v22  ;;  %v1900_v58 = vadd.f32 %v3842_v26, %v5228_v19  ;;  %v1891_v1 = vpop.f32.mrf.mxu1 }
 0x1da   : > { %v2588_v13 = vadd.f32 %v5308_v24, %v2533_v53  ;;  %v2531_v27 = vadd.f32 %v2354_v37, %v1879_v20  ;;  %v3166_v62 = vsel %vm2629_vm7, %v3118_v2, 0.0  ;;  %v3123_v56 = vmul.f32 %v2973_v51, %v2973_v51  ;;  %v5369_v37 = vpop.permute.xlu0 %2814 }
 0x1db   : > { %2634 = vst.msk [vmem:[%s5316_s18 + $0x20] sm:$0xff] %vm2629_vm7, %v2585_v63  ;;  %v2971_v0 = vmul.f32 %v5264_v3, %v2585_v63  ;;  %v3892_v39 = vpop.f32.mrf.mxu0  ;;  %v3019_v18 = vadd.f32 %v3018_v29, %v3017_v59  ;;  %v3167_v22 = vadd.f32 %v3166_v62, %v3165_v5  ;;  %v3020_v53 = vsel %vm2629_vm7, %v2970_v8, 0.0  ;;  %v3843_v63 = vpop.f32.mrf.mxu1 }
 0x1dc   : > { %2637 = vst.msk [vmem:[%s5316_s18 + $0x38] sm:$0xff] %vm2629_vm7, %v2588_v13  ;;  %v2974_v19 = vmul.f32 %v5278_v48, %v2588_v13  ;;  %v2586_v57 = vadd.f32 %v5308_v24, %v2531_v27  ;;  %v3170_v20 = vsel %vm2629_vm7, %v3120_v15, 0.0  ;;  %v2536_v2 = vadd.f32 %v3892_v39, %v1900_v58 }
 0x1dd   : > { %v3121_v45 = vmul.f32 %v2971_v0, %v2971_v0  ;;  %v2367_v3 = vpop.f32.mrf.mxu0  ;;  %v3169_v26 = vadd.f32 %v3168_v16, %v3167_v22  ;;  %v3026_v29 = vsel %vm2629_vm7, %v2973_v51, 0.0  ;;  %v3176_v59 = vsel %vm2629_vm7, %v3123_v56, 0.0  ;;  %v1894_v58 = vpop.f32.mrf.mxu1 }
 0x1de   : > { %v3021_v5 = vadd.f32 %v3020_v53, %v3019_v18  ;;  %2635 = vst.msk [vmem:[%s5316_s18 + $0x28] sm:$0xff] %vm2629_vm7, %v2586_v57  ;;  %v3022_v48 = vsel %vm2629_vm7, %v2971_v0, 0.0  ;;  %v2972_v8 = vmul.f32 %v5268_v23, %v2586_v57  ;;  %v2591_v15 = vadd.f32 %v5308_v24, %v2536_v2  ;;  %v5384_v53 = vpop.permute.xlu1 %2819 }
 0x1df   : > { %v1892_v13 = vadd.f32 %v1891_v1, %v5232_v31  ;;  %v3893_v27 = vpop.f32.mrf.mxu0  ;;  %v3171_v16 = vadd.f32 %v3170_v20, %v3169_v26  ;;  %v3124_v39 = vmul.f32 %v2974_v19, %v2974_v19  ;;  %v1903_v51 = vadd.f32 %v3843_v63, %v5236_v17  ;;  %v3846_v57 = vpop.f32.mrf.mxu1 }
 0x1e0   : > { %v3023_v62 = vadd.f32 %v3022_v48, %v3021_v5  ;;  %v3172_v56 = vsel %vm2629_vm7, %v3121_v45, 0.0  ;;  %v3024_v18 = vsel %vm2629_vm7, %v2972_v8, 0.0  ;;  %v3122_v22 = vmul.f32 %v2972_v8, %v2972_v8  ;;  %2640 = vst.msk [vmem:[%s5316_s18 + $0x50] sm:$0xff] %vm2629_vm7, %v2591_v15  ;;  %v5391_v48 = vpop.permute.xlu0 %2824 }
 0x1e1   : > { %v2534_v0 = vadd.f32 %v2367_v3, %v1892_v13  ;;  %v2370_v23 = vpop.f32.mrf.mxu0  ;;  %v3173_v31 = vadd.f32 %v3172_v56, %v3171_v16  ;;  %v2537_v2 = vadd.f32 %v3893_v27, %v1903_v51  ;;  %v1895_v20 = vadd.f32 %v1894_v58, %v5240_v61  ;;  %v1907_v3 = vpop.f32.mrf.mxu1 }
 0x1e2   : > { %v3025_v1 = vadd.f32 %v3024_v18, %v3023_v62  ;;  %v3028_v17 = vsel %vm2629_vm7, %v2974_v19, 0.0  ;;  %v3174_v45 = vsel %vm2629_vm7, %v3122_v22, 0.0  ;;  %v2977_v63 = vmul.f32 %v5303_v54, %v2591_v15 }
 0x1e3   : > { %v2589_v26 = vadd.f32 %v5308_v24, %v2534_v0  ;;  %v3896_v5 = vpop.f32.mrf.mxu0  ;;  %v3175_v13 = vadd.f32 %v3174_v45, %v3173_v31  ;;  %v2592_v62 = vadd.f32 %v5308_v24, %v2537_v2  ;;  %v2535_v27 = vadd.f32 %v2370_v23, %v1895_v20  ;;  %v3847_v16 = vpop.f32.mrf.mxu1 }
 0x1e4   : > { %v3027_v8 = vadd.f32 %v3026_v29, %v3025_v1  ;;  %v3178_v61 = vsel %vm2629_vm7, %v3124_v39, 0.0  ;;  %v1916_v54 = vadd.f32 %v3846_v57, %v5244_v43  ;;  %v1908_v15 = vadd.f32 %v1907_v3, %v5250_v33  ;;  %v5405_v57 = vpop.permute.xlu1 %2829 }
 0x1e5   : > { %2638 = vst.msk [vmem:[%s5316_s18 + $0x40] sm:$0xff] %vm2629_vm7, %v2589_v26  ;;  %v2975_v19 = vmul.f32 %v5288_v21, %v2589_v26  ;;  %v2383_v58 = vpop.f32.mrf.mxu0  ;;  %v3177_v51 = vadd.f32 %v3176_v59, %v3175_v13  ;;  %2641 = vst.msk [vmem:[%s5316_s18 + $0x58] sm:$0xff] %vm2629_vm7, %v2592_v62  ;;  %v2978_v29 = vmul.f32 %v5310_v36, %v2592_v62  ;;  %v1910_v43 = vpop.f32.mrf.mxu1  ;;  %v3034_v3 = vsel %vm2629_vm7, %v2977_v63, 0.0 }
 0x1e6   : > { %v3029_v56 = vadd.f32 %v3028_v17, %v3027_v8  ;;  %v2590_v18 = vadd.f32 %v5308_v24, %v2535_v27  ;;  %v2540_v0 = vadd.f32 %v3896_v5, %v1916_v54  ;;  %v2538_v21 = vadd.f32 %v2383_v58, %v1908_v15  ;;  %v5413_v5 = vpop.permute.xlu0 %2834 }
 0x1e7   : > { %v3030_v39 = vsel %vm2629_vm7, %v2975_v19, 0.0  ;;  %v3125_v22 = vmul.f32 %v2975_v19, %v2975_v19  ;;  %v3897_v23 = vpop.f32.mrf.mxu0  ;;  %v3127_v33 = vmul.f32 %v2977_v63, %v2977_v63  ;;  %v3179_v59 = vadd.f32 %v3178_v61, %v3177_v51  ;;  %v3850_v26 = vpop.f32.mrf.mxu1 }
 0x1e8   : > { %v3031_v31 = vadd.f32 %v3030_v39, %v3029_v56  ;;  %v3128_v1 = vmul.f32 %v2978_v29, %v2978_v29  ;;  %2639 = vst.msk [vmem:[%s5316_s18 + $0x48] sm:$0xff] %vm2629_vm7, %v2590_v18  ;;  %v2976_v2 = vmul.f32 %v5294_v41, %v2590_v18  ;;  %v2595_v20 = vadd.f32 %v5308_v24, %v2540_v0 }
 0x1e9   : > { %v3180_v36 = vsel %vm2629_vm7, %v3125_v22, 0.0  ;;  %v2593_v17 = vadd.f32 %v5308_v24, %v2538_v21  ;;  %v2386_v45 = vpop.f32.mrf.mxu0  ;;  %v1919_v13 = vadd.f32 %v3847_v16, %v5254_v50  ;;  %v1911_v62 = vadd.f32 %v1910_v43, %v5258_v10  ;;  %v1923_v15 = vpop.f32.mrf.mxu1 }
 0x1ea   : > { %v3181_v8 = vadd.f32 %v3180_v36, %v3179_v59  ;;  %v3032_v27 = vsel %vm2629_vm7, %v2976_v2, 0.0  ;;  %v3126_v61 = vmul.f32 %v2976_v2, %v2976_v2  ;;  %2644 = vst.msk [vmem:[%s5316_s18 + $0x70] sm:$0xff] %vm2629_vm7, %v2595_v20  ;;  %v2981_v41 = vmul.f32 %v5336_v12, %v2595_v20  ;;  %v5430_v22 = vpop.permute.xlu1 %2839 }
 0x1eb   : > { %2642 = vst.msk [vmem:[%s5316_s18 + $0x60] sm:$0xff] %vm2629_vm7, %v2593_v17  ;;  %v2979_v19 = vmul.f32 %v5320_v32, %v2593_v17  ;;  %v3900_v54 = vpop.f32.mrf.mxu0  ;;  %v3033_v58 = vadd.f32 %v3032_v27, %v3031_v31  ;;  %v2541_v63 = vadd.f32 %v3897_v23, %v1919_v13  ;;  %v2539_v51 = vadd.f32 %v2386_v45, %v1911_v62  ;;  %v3851_v39 = vpop.f32.mrf.mxu1 }
 0x1ec   : > { %v1932_v50 = vadd.f32 %v3850_v26, %v5262_v9  ;;  %v3184_v10 = vsel %vm2629_vm7, %v3127_v33, 0.0  ;;  %v3036_v16 = vsel %vm2629_vm7, %v2978_v29, 0.0  ;;  %v3186_v56 = vsel %vm2629_vm7, %v3128_v1, 0.0  ;;  %v5435_v1 = vpop.permute.xlu0 %2844 }
 0x1ed   : > { %v3182_v18 = vsel %vm2629_vm7, %v3126_v61, 0.0  ;;  %v2399_v12 = vpop.f32.mrf.mxu0  ;;  %v3035_v32 = vadd.f32 %v3034_v3, %v3033_v58  ;;  %v3129_v21 = vmul.f32 %v2979_v19, %v2979_v19  ;;  %v2596_v23 = vadd.f32 %v5308_v24, %v2541_v63  ;;  %v1926_v59 = vpop.f32.mrf.mxu1 }
 0x1ee   : > { %v3183_v0 = vadd.f32 %v3182_v18, %v3181_v8  ;;  %v3131_v9 = vmul.f32 %v2981_v41, %v2981_v41  ;;  %v2594_v43 = vadd.f32 %v5308_v24, %v2539_v51  ;;  %v2544_v33 = vadd.f32 %v3900_v54, %v1932_v50  ;;  %v5451_v63 = vpop.permute.xlu1 %2849 }
 0x1ef   : > { %v1924_v29 = vadd.f32 %v1923_v15, %v5266_v28  ;;  %v3901_v31 = vpop.f32.mrf.mxu0  ;;  %v3037_v2 = vadd.f32 %v3036_v16, %v3035_v32  ;;  %v3038_v20 = vsel %vm2629_vm7, %v2979_v19, 0.0  ;;  %2645 = vst.msk [vmem:[%s5316_s18 + $0x78] sm:$0xff] %vm2629_vm7, %v2596_v23  ;;  %v2982_v17 = vmul.f32 %v5345_v46, %v2596_v23  ;;  %v3854_v13 = vpop.f32.mrf.mxu1 }
 0x1f0   : > { %v3185_v36 = vadd.f32 %v3184_v10, %v3183_v0  ;;  %2643 = vst.msk [vmem:[%s5316_s18 + $0x68] sm:$0xff] %vm2629_vm7, %v2594_v43  ;;  %v2980_v45 = vmul.f32 %v5326_v4, %v2594_v43  ;;  %v2599_v26 = vadd.f32 %v5308_v24, %v2544_v33  ;;  %v1935_v3 = vadd.f32 %v3851_v39, %v5272_v49  ;;  %v5460_v0 = vpop.permute.xlu0 %2854 }
 0x1f1   : > { %v2542_v28 = vadd.f32 %v2399_v12, %v1924_v29  ;;  %v2402_v8 = vpop.f32.mrf.mxu0  ;;  %v3039_v62 = vadd.f32 %v3038_v20, %v3037_v2  ;;  %v3188_v61 = vsel %vm2629_vm7, %v3129_v21, 0.0  ;;  %v3132_v19 = vmul.f32 %v2982_v17, %v2982_v17  ;;  %v1939_v58 = vpop.f32.mrf.mxu1 }
 0x1f2   : > { %v3187_v27 = vadd.f32 %v3186_v56, %v3185_v36  ;;  %v3040_v54 = vsel %vm2629_vm7, %v2980_v45, 0.0  ;;  %v3130_v46 = vmul.f32 %v2980_v45, %v2980_v45  ;;  %2648 = vst.msk [vmem:[%s5316_s18 + $0x90] sm:$0xff] %vm2629_vm7, %v2599_v26  ;;  %v3042_v49 = vsel %vm2629_vm7, %v2981_v41, 0.0 }
 0x1f3   : > { %v2597_v4 = vadd.f32 %v5308_v24, %v2542_v28  ;;  %v3904_v15 = vpop.f32.mrf.mxu0  ;;  %v3041_v50 = vadd.f32 %v3040_v54, %v3039_v62  ;;  %v2545_v10 = vadd.f32 %v3901_v31, %v1935_v3  ;;  %v3192_v16 = vsel %vm2629_vm7, %v3131_v9, 0.0  ;;  %v3855_v32 = vpop.f32.mrf.mxu1 }
 0x1f4   : > { %v3189_v51 = vadd.f32 %v3188_v61, %v3187_v27  ;;  %v3190_v56 = vsel %vm2629_vm7, %v3130_v46, 0.0  ;;  %v2985_v18 = vmul.f32 %v5384_v53, %v2599_v26  ;;  %v1927_v43 = vadd.f32 %v1926_v59, %v5280_v35  ;;  %v5473_v62 = vpop.permute.xlu1 %2859  ;;  %v5479_v46 = vpop.permute.xlu0 %2864 }
 0x1f5   : > { %2646 = vst.msk [vmem:[%s5316_s18 + $0x80] sm:$0xff] %vm2629_vm7, %v2597_v4  ;;  %v2983_v12 = vmul.f32 %v5361_v14, %v2597_v4  ;;  %v2415_v39 = vpop.f32.mrf.mxu0  ;;  %v3043_v21 = vadd.f32 %v3042_v49, %v3041_v50  ;;  %v2600_v23 = vadd.f32 %v5308_v24, %v2545_v10  ;;  %v3044_v9 = vsel %vm2629_vm7, %v2982_v17, 0.0  ;;  %v1942_v14 = vpop.f32.mrf.mxu1 }
 0x1f6   : > { %v3191_v41 = vadd.f32 %v3190_v56, %v3189_v51  ;;  %v3194_v33 = vsel %vm2629_vm7, %v3132_v19, 0.0  ;;  %v1948_v29 = vadd.f32 %v3854_v13, %v5284_v6  ;;  %v2543_v45 = vadd.f32 %v2402_v8, %v1927_v43 }
 0x1f7   : > { %v3133_v53 = vmul.f32 %v2983_v12, %v2983_v12  ;;  %v3905_v31 = vpop.f32.mrf.mxu0  ;;  %v3045_v2 = vadd.f32 %v3044_v9, %v3043_v21  ;;  %2649 = vst.msk [vmem:[%s5316_s18 + $0x98] sm:$0xff] %vm2629_vm7, %v2600_v23  ;;  %v2986_v20 = vmul.f32 %v5391_v48, %v2600_v23  ;;  %v3050_v26 = vsel %vm2629_vm7, %v2985_v18, 0.0  ;;  %v3858_v3 = vpop.f32.mrf.mxu1 }
 0x1f8   : > { %v3193_v36 = vadd.f32 %v3192_v16, %v3191_v41  ;;  %v2548_v28 = vadd.f32 %v3904_v15, %v1948_v29  ;;  %v1940_v35 = vadd.f32 %v1939_v58, %v5290_v25  ;;  %v1951_v59 = vadd.f32 %v3855_v32, %v5296_v44  ;;  %v5498_v43 = vpop.permute.xlu1 %2869 }
 0x1f9   : > { %v2418_v17 = vpop.f32.mrf.mxu0  ;;  %v3135_v6 = vmul.f32 %v2985_v18, %v2985_v18  ;;  %v3046_v13 = vsel %vm2629_vm7, %v2983_v12, 0.0  ;;  %v3196_v48 = vsel %vm2629_vm7, %v3133_v53, 0.0  ;;  %v2598_v8 = vadd.f32 %v5308_v24, %v2543_v45  ;;  %v1955_v44 = vpop.f32.mrf.mxu1 }
 0x1fa   : > { %v3195_v27 = vadd.f32 %v3194_v33, %v3193_v36  ;;  %v2603_v61 = vadd.f32 %v5308_v24, %v2548_v28  ;;  %v2546_v19 = vadd.f32 %v2415_v39, %v1940_v35  ;;  %v2549_v25 = vadd.f32 %v3905_v31, %v1951_v59  ;;  %v5506_v28 = vpop.permute.xlu0 %2874 }
 0x1fb   : > { %v3908_v54 = vpop.f32.mrf.mxu0  ;;  %v3047_v4 = vadd.f32 %v3046_v13, %v3045_v2  ;;  %v3136_v15 = vmul.f32 %v2986_v20, %v2986_v20  ;;  %v1943_v58 = vadd.f32 %v1942_v14, %v5300_v30  ;;  %v1964_v49 = vadd.f32 %v3858_v3, %v5194_v40  ;;  %2647 = vst.msk [vmem:[%s5316_s18 + $0x88] sm:$0xff] %vm2629_vm7, %v2598_v8  ;;  %v3859_v18 = vpop.f32.mrf.mxu1 }
 0x1fc   : > { %v2984_v51 = vmul.f32 %v5369_v37, %v2598_v8  ;;  %2652 = vst.msk [vmem:[%s5316_s18 + $0xb0] sm:$0xff] %vm2629_vm7, %v2603_v61  ;;  %v2989_v50 = vmul.f32 %v5430_v22, %v2603_v61  ;;  %v2601_v10 = vadd.f32 %v5308_v24, %v2546_v19  ;;  %v2604_v16 = vadd.f32 %v5308_v24, %v2549_v25 }
 0x1fd   : > { %v2431_v56 = vpop.f32.mrf.mxu0  ;;  %v3197_v12 = vadd.f32 %v3196_v48, %v3195_v27  ;;  %v2547_v30 = vadd.f32 %v2418_v17, %v1943_v58  ;;  %v2552_v39 = vadd.f32 %v3908_v54, %v1964_v49  ;;  %v1956_v40 = vadd.f32 %v1955_v44, %v5196_v11  ;;  %v1958_v23 = vpop.f32.mrf.mxu1 }
 0x1fe   : > { %v3200_v32 = vsel %vm2629_vm7, %v3135_v6, 0.0  ;;  %v3048_v37 = vsel %vm2629_vm7, %v2984_v51, 0.0  ;;  %v3134_v21 = vmul.f32 %v2984_v51, %v2984_v51  ;;  %v3139_v41 = vmul.f32 %v2989_v50, %v2989_v50  ;;  %2650 = vst.msk [vmem:[%s5316_s18 + $0xa0] sm:$0xff] %vm2629_vm7, %v2601_v10  ;;  %2653 = vst.msk [vmem:[%s5316_s18 + $0xb8] sm:$0xff] %vm2629_vm7, %v2604_v16 }
 0x1ff   : > { %v3909_v22 = vpop.f32.mrf.mxu0  ;;  %v3049_v9 = vadd.f32 %v3048_v37, %v3047_v4  ;;  %v2987_v33 = vmul.f32 %v5405_v57, %v2601_v10  ;;  %v2990_v11 = vmul.f32 %v5435_v1, %v2604_v16  ;;  %v2602_v53 = vadd.f32 %v5308_v24, %v2547_v30  ;;  %v3862_v45 = vpop.f32.mrf.mxu1 }
 0x200   : > { %v3052_v29 = vsel %vm2629_vm7, %v2986_v20, 0.0  ;;  %v3198_v31 = vsel %vm2629_vm7, %v3134_v21, 0.0  ;;  %v2607_v14 = vadd.f32 %v5308_v24, %v2552_v39  ;;  %v2550_v36 = vadd.f32 %v2431_v56, %v1956_v40 }
 0x201   : > { %v2434_v2 = vpop.f32.mrf.mxu0  ;;  %v3202_v35 = vsel %vm2629_vm7, %v3136_v15, 0.0  ;;  %v3051_v59 = vadd.f32 %v3050_v26, %v3049_v9  ;;  %v3199_v57 = vadd.f32 %v3198_v31, %v3197_v12  ;;  %v3137_v17 = vmul.f32 %v2987_v33, %v2987_v33  ;;  %2651 = vst.msk [vmem:[%s5316_s18 + $0xa8] sm:$0xff] %vm2629_vm7, %v2602_v53  ;;  %v1971_v27 = vpop.f32.mrf.mxu1 }
 0x202   : > { %v3058_v1 = vsel %vm2629_vm7, %v2989_v50, 0.0  ;;  %v3208_v20 = vsel %vm2629_vm7, %v3139_v41, 0.0  ;;  %v2988_v3 = vmul.f32 %v5413_v5, %v2602_v53  ;;  %2656 = vst.msk [vmem:[%s5316_s18 + $0xd0] sm:$0xff] %vm2629_vm7, %v2607_v14  ;;  %v1967_v6 = vadd.f32 %v3859_v18, %v5198_v7  ;;  %v2880_v15 = vpop.permute.xlu1 %2879  ;;  %v5528_v12 = vpop.permute.xlu0 %2884 }
 0x203   : > { %v3912_v13 = vpop.f32.mrf.mxu0  ;;  %v3201_v48 = vadd.f32 %v3200_v32, %v3199_v57  ;;  %v3053_v8 = vadd.f32 %v3052_v29, %v3051_v59  ;;  %v3140_v26 = vmul.f32 %v2990_v11, %v2990_v11  ;;  %v2605_v61 = vadd.f32 %v5308_v24, %v2550_v36  ;;  %v3863_v4 = vpop.f32.mrf.mxu1 }
 0x204   : > { %v3054_v19 = vsel %vm2629_vm7, %v2987_v33, 0.0  ;;  %v3056_v25 = vsel %vm2629_vm7, %v2988_v3, 0.0  ;;  %v3138_v54 = vmul.f32 %v2988_v3, %v2988_v3  ;;  %v2993_v44 = vmul.f32 %v5473_v62, %v2607_v14 }
 0x205   : > { %v2447_v5 = vpop.f32.mrf.mxu0  ;;  %v3055_v58 = vadd.f32 %v3054_v19, %v3053_v8  ;;  %v3203_v7 = vadd.f32 %v3202_v35, %v3201_v48  ;;  %v3204_v49 = vsel %vm2629_vm7, %v3137_v17, 0.0  ;;  %2654 = vst.msk [vmem:[%s5316_s18 + $0xc0] sm:$0xff] %vm2629_vm7, %v2605_v61  ;;  %v2991_v51 = vmul.f32 %v5451_v63, %v2605_v61  ;;  %v1974_v62 = vpop.f32.mrf.mxu1 }
 0x206   : > { %v3206_v50 = vsel %vm2629_vm7, %v3138_v54, 0.0  ;;  %v2553_v10 = vadd.f32 %v3909_v22, %v1967_v6  ;;  %v1959_v16 = vadd.f32 %v1958_v23, %v5202_v52  ;;  %v1980_v56 = vadd.f32 %v3862_v45, %v5206_v60  ;;  %v5548_v6 = vpop.permute.xlu0 %2894 }
 0x207   : > { %v3913_v18 = vpop.f32.mrf.mxu0  ;;  %v3205_v30 = vadd.f32 %v3204_v49, %v3203_v7  ;;  %v3060_v39 = vsel %vm2629_vm7, %v2990_v11, 0.0  ;;  %v3210_v40 = vsel %vm2629_vm7, %v3140_v26, 0.0  ;;  %v3057_v32 = vadd.f32 %v3056_v25, %v3055_v58  ;;  %v3866_v52 = vpop.f32.mrf.mxu1 }
 0x208   : > { %v3143_v37 = vmul.f32 %v2993_v44, %v2993_v44  ;;  %v2608_v63 = vadd.f32 %v5308_v24, %v2553_v10  ;;  %v2551_v21 = vadd.f32 %v2434_v2, %v1959_v16  ;;  %v2556_v41 = vadd.f32 %v3912_v13, %v1980_v56  ;;  %v5540_v2 = vpop.permute.xlu1 %2889 }
 0x209   : > { %v2450_v22 = vpop.f32.mrf.mxu0  ;;  %v3059_v23 = vadd.f32 %v3058_v1, %v3057_v32  ;;  %v3207_v60 = vadd.f32 %v3206_v50, %v3205_v30  ;;  %v1972_v9 = vadd.f32 %v1971_v27, %v5210_v47  ;;  %v1983_v33 = vadd.f32 %v3863_v4, %v5214_v55  ;;  %v1987_v36 = vpop.f32.mrf.mxu1 }
 0x20a   : > { %v3141_v53 = vmul.f32 %v2991_v51, %v2991_v51  ;;  %2657 = vst.msk [vmem:[%s5316_s18 + $0xd8] sm:$0xff] %vm2629_vm7, %v2608_v63  ;;  %v2994_v11 = vmul.f32 %v5479_v46, %v2608_v63  ;;  %v2606_v29 = vadd.f32 %v5308_v24, %v2551_v21  ;;  %v2611_v31 = vadd.f32 %v5308_v24, %v2556_v41 }
 0x20b   : > { %v3916_v14 = vpop.f32.mrf.mxu0  ;;  %v3209_v45 = vadd.f32 %v3208_v20, %v3207_v60  ;;  %v3061_v35 = vadd.f32 %v3060_v39, %v3059_v23  ;;  %v2554_v47 = vadd.f32 %v2447_v5, %v1972_v9  ;;  %v2557_v59 = vadd.f32 %v3913_v18, %v1983_v33  ;;  %v3867_v3 = vpop.f32.mrf.mxu1  ;;  %v5813_v9 = vld [vmem:[#allocation9_spill] sm:$0xff] }
 0x20c   : > { %v3062_v55 = vsel %vm2629_vm7, %v2991_v51, 0.0  ;;  %v3144_v57 = vmul.f32 %v2994_v11, %v2994_v11  ;;  %2655 = vst.msk [vmem:[%s5316_s18 + $0xc8] sm:$0xff] %vm2629_vm7, %v2606_v29  ;;  %v2992_v17 = vmul.f32 %v5460_v0, %v2606_v29  ;;  %2660 = vst.msk [vmem:[%s5316_s18 + $0xf0] sm:$0xff] %vm2629_vm7, %v2611_v31  ;;  %v2997_v46 = vmul.f32 %v2880_v15, %v2611_v31  ;;  %v2900_v10 = vpop.permute.xlu1 %2899 }
 0x20d   : > { %v2463_v1 = vpop.f32.mrf.mxu0  ;;  %v3063_v20 = vadd.f32 %v3062_v55, %v3061_v35  ;;  %v3211_v13 = vadd.f32 %v3210_v40, %v3209_v45  ;;  %v2609_v27 = vadd.f32 %v5308_v24, %v2554_v47  ;;  %v2612_v48 = vadd.f32 %v5308_v24, %v2557_v59  ;;  %v1990_v25 = vpop.f32.mrf.mxu1  ;;  %v5815_v35 = vld [vmem:[#allocation11_spill] sm:$0xff] }
 0x20e   : > { %v3066_v8 = vsel %vm2629_vm7, %v2993_v44, 0.0  ;;  %v3212_v26 = vsel %vm2629_vm7, %v3141_v53, 0.0  ;;  %v3064_v0 = vsel %vm2629_vm7, %v2992_v17, 0.0  ;;  %v3142_v61 = vmul.f32 %v2992_v17, %v2992_v17 }
 0x20f   : > { %v3917_v19 = vpop.f32.mrf.mxu0  ;;  %v3216_v54 = vsel %vm2629_vm7, %v3143_v37, 0.0  ;;  %v3213_v5 = vadd.f32 %v3212_v26, %v3211_v13  ;;  %v3065_v4 = vadd.f32 %v3064_v0, %v3063_v20  ;;  %2658 = vst.msk [vmem:[%s5316_s18 + $0xe0] sm:$0xff] %vm2629_vm7, %v2609_v27  ;;  %v2995_v15 = vmul.f32 %v5498_v43, %v2609_v27  ;;  %2661 = vst.msk [vmem:[%s5316_s18 + $0xf8] sm:$0xff] %vm2629_vm7, %v2612_v48  ;;  %v3870_v50 = vpop.f32.mrf.mxu1 }
 0x210   : > { %v3068_v58 = vsel %vm2629_vm7, %v2994_v11, 0.0  ;;  %v3214_v44 = vsel %vm2629_vm7, %v3142_v61, 0.0  ;;  %v1975_v7 = vadd.f32 %v1974_v62, %v5218_v38  ;;  %v1996_v49 = vadd.f32 %v3866_v52, %v5222_v42  ;;  %v2905_v38 = vpop.permute.xlu0 %2904 }
 0x211   : > { %v2466_v51 = vpop.f32.mrf.mxu0  ;;  %v3218_v16 = vsel %vm2629_vm7, %v3144_v57, 0.0  ;;  %v3067_v56 = vadd.f32 %v3066_v8, %v3065_v4  ;;  %v3215_v18 = vadd.f32 %v3214_v44, %v3213_v5  ;;  %v3074_v30 = vsel %vm2629_vm7, %v2997_v46, 0.0  ;;  %v2003_v63 = vpop.f32.mrf.mxu1 }
 0x212   : > { %v3147_v43 = vmul.f32 %v2997_v46, %v2997_v46  ;;  %v3145_v39 = vmul.f32 %v2995_v15, %v2995_v15  ;;  %v2998_v40 = vmul.f32 %v5528_v12, %v2612_v48  ;;  %v2555_v32 = vadd.f32 %v2450_v22, %v1975_v7  ;;  %v5583_v57 = vpop.permute.xlu1 %2909 }
 0x213   : > { %v3920_v37 = vpop.f32.mrf.mxu0  ;;  %v3217_v62 = vadd.f32 %v3216_v54, %v3215_v18  ;;  %v3069_v42 = vadd.f32 %v3068_v58, %v3067_v56  ;;  %v2560_v21 = vadd.f32 %v3916_v14, %v1996_v49  ;;  %v1988_v41 = vadd.f32 %v1987_v36, %v5226_v34  ;;  %v5573_v12 = vpop.f32.mrf.mxu1  ;;  %v5814_v36 = vld [vmem:[#allocation10_spill] sm:$0xff] }
 0x214   : > { %v3070_v52 = vsel %vm2629_vm7, %v2995_v15, 0.0  ;;  %v3220_v23 = vsel %vm2629_vm7, %v3145_v39, 0.0  ;;  %v2610_v60 = vadd.f32 %v5308_v24, %v2555_v32  ;;  %v1999_v33 = vadd.f32 %v3867_v3, %v5813_v9  ;;  %v5590_v26 = vpop.permute.xlu0 %2914 }
 0x215   : > { %v2479_v53 = vpop.f32.mrf.mxu0  ;;  %v3071_v22 = vadd.f32 %v3070_v52, %v3069_v42  ;;  %v3219_v11 = vadd.f32 %v3218_v16, %v3217_v62  ;;  %v2615_v29 = vadd.f32 %v5308_v24, %v2560_v21  ;;  %v2558_v31 = vadd.f32 %v2463_v1, %v1988_v41  ;;  %v2006_v55 = vpop.f32.mrf.mxu1 }
 0x216   : > { %2659 = vst.msk [vmem:[%s5316_s18 + $0xe8] sm:$0xff] %vm2629_vm7, %v2610_v60  ;;  %v2996_v34 = vmul.f32 %v5506_v28, %v2610_v60  ;;  %v2561_v14 = vadd.f32 %v3917_v19, %v1999_v33  ;;  %v1991_v45 = vadd.f32 %v1990_v25, %v5814_v36  ;;  %v2012_v47 = vadd.f32 %v3870_v50, %v5815_v35  ;;  %v5816_v25 = vld [vmem:[#allocation12_spill] sm:$0xff]  ;;  %v2920_v32 = vpop.permute.xlu1 %2919 }
 0x217   : > { %v5581_v59 = vpop.f32.mrf.mxu0  ;;  %v3221_v17 = vadd.f32 %v3220_v23, %v3219_v11  ;;  %v3148_v46 = vmul.f32 %v2998_v40, %v2998_v40  ;;  %2664 = vst.msk [vmem:[%s5316_s18 + $0x110] sm:$0xff] %vm2629_vm7, %v2615_v29  ;;  %v3001_v1 = vmul.f32 %v2900_v10, %v2615_v29  ;;  %v2613_v3 = vadd.f32 %v5308_v24, %v2558_v31  ;;  %v3874_v8 = vpop.f32.mrf.mxu1  ;;  %v5818_v29 = vld [vmem:[#allocation14_spill] sm:$0xff] }
 0x218   : > { %v3072_v28 = vsel %vm2629_vm7, %v2996_v34, 0.0  ;;  %v3146_v20 = vmul.f32 %v2996_v34, %v2996_v34  ;;  %v2616_v13 = vadd.f32 %v5308_v24, %v2561_v14  ;;  %v2559_v27 = vadd.f32 %v2466_v51, %v1991_v45  ;;  %v2925_v33 = vpop.permute.xlu0 %2924  ;;  %v5819_v34 = vld [vmem:[#allocation15_spill] sm:$0xff] }
 0x219   : > { %v2482_v48 = vpop.f32.mrf.mxu0  ;;  %v3224_v0 = vsel %vm2629_vm7, %v3147_v43, 0.0  ;;  %v3073_v61 = vadd.f32 %v3072_v28, %v3071_v22  ;;  %2662 = vst.msk [vmem:[%s5316_s18 + $0x100] sm:$0xff] %vm2629_vm7, %v2613_v3  ;;  %v2999_v19 = vmul.f32 %v5540_v2, %v2613_v3  ;;  %v2004_v54 = vadd.f32 %v2003_v63, %v5816_v25  ;;  %v2019_v7 = vpop.f32.mrf.mxu1  ;;  %v5817_v22 = vld [vmem:[#allocation13_spill] sm:$0xff] }
 0x21a   : > { %v3222_v5 = vsel %vm2629_vm7, %v3146_v20, 0.0  ;;  %2665 = vst.msk [vmem:[%s5316_s18 + $0x118] sm:$0xff] %vm2629_vm7, %v2616_v13  ;;  %v3002_v4 = vmul.f32 %v2905_v38, %v2616_v13  ;;  %v2614_v15 = vadd.f32 %v5308_v24, %v2559_v27  ;;  %v2564_v58 = vadd.f32 %v3920_v37, %v2012_v47  ;;  %v5820_v27 = vld [vmem:[#allocation16_spill] sm:$0xff] }
 0x21b   : > { %v3924_v44 = vpop.f32.mrf.mxu0  ;;  %v3076_v49 = vsel %vm2629_vm7, %v2998_v40, 0.0  ;;  %v3226_v51 = vsel %vm2629_vm7, %v3148_v46, 0.0  ;;  %v3075_v50 = vadd.f32 %v3074_v30, %v3073_v61  ;;  %v3223_v10 = vadd.f32 %v3222_v5, %v3221_v17  ;;  %v3875_v39 = vpop.f32.mrf.mxu1 }
 0x21c   : > { %v3082_v2 = vsel %vm2629_vm7, %v3001_v1, 0.0  ;;  %v3151_v16 = vmul.f32 %v3001_v1, %v3001_v1  ;;  %v3149_v56 = vmul.f32 %v2999_v19, %v2999_v19  ;;  %2663 = vst.msk [vmem:[%s5316_s18 + $0x108] sm:$0xff] %vm2629_vm7, %v2614_v15  ;;  %v3000_v18 = vmul.f32 %v5548_v6, %v2614_v15  ;;  %v2935_v15 = vpop.permute.xlu0 %2934 }
 0x21d   : > { %v2495_v43 = vpop.f32.mrf.mxu0  ;;  %v3225_v37 = vadd.f32 %v3224_v0, %v3223_v10  ;;  %v3077_v63 = vadd.f32 %v3076_v49, %v3075_v50  ;;  %v2619_v40 = vadd.f32 %v5308_v24, %v2564_v58  ;;  %v2562_v38 = vadd.f32 %v2479_v53, %v2004_v54  ;;  %v5610_v52 = vpop.f32.mrf.mxu1  ;;  %v5821_v49 = vld [vmem:[#allocation17_spill] sm:$0xff] }
 0x21e   : > { %v3078_v30 = vsel %vm2629_vm7, %v2999_v19, 0.0  ;;  %v3152_v62 = vmul.f32 %v3002_v4, %v3002_v4  ;;  %v3080_v42 = vsel %vm2629_vm7, %v3000_v18, 0.0  ;;  %v3150_v21 = vmul.f32 %v3000_v18, %v3000_v18  ;;  %v2930_v0 = vpop.permute.xlu1 %2929 }
 0x21f   : > { %v3925_v41 = vpop.f32.mrf.mxu0  ;;  %v3079_v6 = vadd.f32 %v3078_v30, %v3077_v63  ;;  %v3227_v23 = vadd.f32 %v3226_v51, %v3225_v37  ;;  %v3228_v60 = vsel %vm2629_vm7, %v3149_v56, 0.0  ;;  %2668 = vst.msk [vmem:[%s5316_s18 + $0x130] sm:$0xff] %vm2629_vm7, %v2619_v40  ;;  %v2617_v9 = vadd.f32 %v5308_v24, %v2562_v38  ;;  %v3878_v28 = vpop.f32.mrf.mxu1 }
 0x220   : > { %v3230_v53 = vsel %vm2629_vm7, %v3150_v21, 0.0  ;;  %v2015_v11 = vadd.f32 %v5573_v12, %v5817_v22  ;;  %v2007_v31 = vadd.f32 %v2006_v55, %v5818_v29  ;;  %v2028_v14 = vadd.f32 %v3874_v8, %v5819_v34 }
 0x221   : > { %v5621_v36 = vpop.f32.mrf.mxu0  ;;  %v3232_v45 = vsel %vm2629_vm7, %v3151_v16, 0.0  ;;  %v3229_v35 = vadd.f32 %v3228_v60, %v3227_v23  ;;  %v3084_v47 = vsel %vm2629_vm7, %v3002_v4, 0.0  ;;  %v3081_v17 = vadd.f32 %v3080_v42, %v3079_v6  ;;  %2666 = vst.msk [vmem:[%s5316_s18 + $0x120] sm:$0xff] %vm2629_vm7, %v2617_v9  ;;  %v2035_v50 = vpop.f32.mrf.mxu1  ;;  %v5822_v60 = vld [vmem:[#allocation18_spill] sm:$0xff] }
 0x222   : > { %v3003_v46 = vmul.f32 %v5583_v57, %v2617_v9  ;;  %v2565_v1 = vadd.f32 %v5581_v59, %v2015_v11  ;;  %v2563_v3 = vadd.f32 %v2482_v48, %v2007_v31  ;;  %v2568_v12 = vadd.f32 %v3924_v44, %v2028_v14  ;;  %v4089_v11 = vld [vmem:[%s5783_s2] ss:$0 sm:$0xff]  ;;  %v5823_v31 = vld [vmem:[#allocation19_spill] sm:$0xff] }
 0x223   : > { %v3083_v55 = vadd.f32 %v3082_v2, %v3081_v17  ;;  %v3231_v20 = vadd.f32 %v3230_v53, %v3229_v35  ;;  %v3005_v13 = vmul.f32 %v2920_v32, %v2619_v40  ;;  %v2020_v8 = vadd.f32 %v2019_v7, %v5820_v27  ;;  %v3928_v54 = vpop.f32.mrf.mxu0  ;;  %v3879_v21 = vpop.f32.mrf.mxu1 }
 0x224   : > { %v3234_v61 = vsel %vm2629_vm7, %v3152_v62, 0.0  ;;  %v3153_v19 = vmul.f32 %v3003_v46, %v3003_v46  ;;  %v2620_v25 = vadd.f32 %v5308_v24, %v2565_v1  ;;  %v2618_v57 = vadd.f32 %v5308_v24, %v2563_v3  ;;  %v5825_v3 = vld [vmem:[#allocation21_spill] sm:$0xff] }
 0x225   : > { %v3233_v59 = vadd.f32 %v3232_v45, %v3231_v20  ;;  %v3085_v48 = vadd.f32 %v3084_v47, %v3083_v55  ;;  %v2623_v5 = vadd.f32 %v5308_v24, %v2568_v12  ;;  %v2566_v4 = vadd.f32 %v2495_v43, %v2020_v8  ;;  %v2511_v37 = vpop.f32.mrf.mxu0  ;;  %v5824_v47 = vld [vmem:[#allocation20_spill] sm:$0xff]  ;;  %v2038_v55 = vpop.f32.mrf.mxu1 }
 0x226   : > { %v3086_v58 = vsel %vm2629_vm7, %v3003_v46, 0.0  ;;  %2669 = vst.msk [vmem:[%s5316_s18 + $0x138] sm:$0xff] %vm2629_vm7, %v2620_v25  ;;  %v3006_v44 = vmul.f32 %v2925_v33, %v2620_v25  ;;  %2667 = vst.msk [vmem:[%s5316_s18 + $0x128] sm:$0xff] %vm2629_vm7, %v2618_v57  ;;  %v3004_v7 = vmul.f32 %v5590_v26, %v2618_v57  ;;  %v2031_v51 = vadd.f32 %v3875_v39, %v5821_v49  ;;  %v2940_v39 = vpop.permute.xlu1 %2939  ;;  %v2945_v33 = vpop.permute.xlu0 %2944 }
 0x227   : > { %v3155_v10 = vmul.f32 %v3005_v13, %v3005_v13  ;;  %v3087_v2 = vadd.f32 %v3086_v58, %v3085_v48  ;;  %v3235_v16 = vadd.f32 %v3234_v61, %v3233_v59  ;;  %2672 = vst.msk [vmem:[%s5316_s18 + $0x150] sm:$0xff] %vm2629_vm7, %v2623_v5  ;;  %v2621_v56 = vadd.f32 %v5308_v24, %v2566_v4  ;;  %v3929_v34 = vpop.f32.mrf.mxu0  ;;  %v5826_v48 = vld [vmem:[#allocation22_spill] sm:$0xff] }
 0x228   : > { %v3236_v18 = vsel %vm2629_vm7, %v3153_v19, 0.0  ;;  %v3088_v43 = vsel %vm2629_vm7, %v3004_v7, 0.0  ;;  %v3154_v32 = vmul.f32 %v3004_v7, %v3004_v7  ;;  %v3090_v63 = vsel %vm2629_vm7, %v3005_v13, 0.0 }
 0x229   : > { %v3237_v40 = vadd.f32 %v3236_v18, %v3235_v16  ;;  %v3089_v26 = vadd.f32 %v3088_v43, %v3087_v2  ;;  %2670 = vst.msk [vmem:[%s5316_s18 + $0x140] sm:$0xff] %vm2629_vm7, %v2621_v56  ;;  %v3156_v38 = vmul.f32 %v3006_v44, %v3006_v44  ;;  %v3007_v62 = vmul.f32 %v2930_v0, %v2621_v56  ;;  %v2514_v25 = vpop.f32.mrf.mxu0 }
 0x22a   : > { %v3238_v30 = vsel %vm2629_vm7, %v3154_v32, 0.0  ;;  %v2569_v42 = vadd.f32 %v3925_v41, %v2031_v51  ;;  %v3240_v24 = vsel %vm2629_vm7, %v3155_v10, 0.0  ;;  %v2023_v9 = vadd.f32 %v5610_v52, %v5822_v60  ;;  %v2950_v8 = vpop.permute.xlu1 %2949  ;;  %v2955_v4 = vpop.permute.xlu0 %2954 }
 0x22b   : > { %v3091_v6 = vadd.f32 %v3090_v63, %v3089_v26  ;;  %v3239_v23 = vadd.f32 %v3238_v30, %v3237_v40  ;;  %v3092_v53 = vsel %vm2629_vm7, %v3006_v44, 0.0  ;;  %v3157_v22 = vmul.f32 %v3007_v62, %v3007_v62 }
 0x22c   : > { %v2624_v29 = vadd.f32 %v4089_v11, %v2569_v42  ;;  %v2044_v41 = vadd.f32 %v3878_v28, %v5823_v31  ;;  %v2567_v35 = vadd.f32 %v5621_v36, %v2023_v9  ;;  %v2036_v17 = vadd.f32 %v2035_v50, %v5824_v47 }
 0x22d   : > { %v3241_v14 = vadd.f32 %v3240_v24, %v3239_v23  ;;  %v3093_v45 = vadd.f32 %v3092_v53, %v3091_v6  ;;  %v3242_v52 = vsel %vm2629_vm7, %v3156_v38, 0.0  ;;  %v3009_v46 = vmul.f32 %v2940_v39, %v2623_v5 }
 0x22e   : > { %2673 = vst.msk [vmem:[%s5316_s18 + $0x158] sm:$0xff] %vm2629_vm7, %v2624_v29  ;;  %v2572_v1 = vadd.f32 %v3928_v54, %v2044_v41  ;;  %v2047_v12 = vadd.f32 %v3879_v21, %v5825_v3  ;;  %v3094_v20 = vsel %vm2629_vm7, %v3007_v62, 0.0  ;;  %v2622_v13 = vadd.f32 %v4089_v11, %v2567_v35  ;;  %v2960_v43 = vpop.permute.xlu1 %2959  ;;  %v2965_v30 = vpop.permute.xlu0 %2964 }
 0x22f   : > { %v3243_v28 = vadd.f32 %v3242_v52, %v3241_v14  ;;  %v2570_v27 = vadd.f32 %v2511_v37, %v2036_v17  ;;  %v3095_v36 = vadd.f32 %v3094_v20, %v3093_v45  ;;  %v3010_v0 = vmul.f32 %v2945_v33, %v2624_v29 }
 0x230   : > { %v2627_v61 = vadd.f32 %v4089_v11, %v2572_v1  ;;  %v2573_v19 = vadd.f32 %v3929_v34, %v2047_v12  ;;  %v3244_v57 = vsel %vm2629_vm7, %v3157_v22, 0.0  ;;  %2671 = vst.msk [vmem:[%s5316_s18 + $0x148] sm:$0xff] %vm2629_vm7, %v2622_v13  ;;  %v3008_v54 = vmul.f32 %v2935_v15, %v2622_v13 }
 0x231   : > { %v2625_v59 = vadd.f32 %v4089_v11, %v2570_v27  ;;  %v2039_v5 = vadd.f32 %v2038_v55, %v5826_v48  ;;  %v3159_v58 = vmul.f32 %v3009_v46, %v3009_v46  ;;  %v3245_v44 = vadd.f32 %v3244_v57, %v3243_v28 }
 0x232   : > { %2676 = vst.msk [vmem:[%s5316_s18 + $0x170] sm:$0xff] %vm2629_vm7, %v2627_v61  ;;  %v2628_v7 = vadd.f32 %v4089_v11, %v2573_v19  ;;  %v3096_v49 = vsel %vm2629_vm7, %v3008_v54, 0.0  ;;  %v3158_v51 = vmul.f32 %v3008_v54, %v3008_v54  ;;  %v3160_v2 = vmul.f32 %v3010_v0, %v3010_v0 }
 0x233   : > { %2674 = vst.msk [vmem:[%s5316_s18 + $0x160] sm:$0xff] %vm2629_vm7, %v2625_v59  ;;  %v3011_v50 = vmul.f32 %v2950_v8, %v2625_v59  ;;  %v2571_v10 = vadd.f32 %v2514_v25, %v2039_v5  ;;  %v3097_v16 = vadd.f32 %v3096_v49, %v3095_v36  ;;  %v3098_v15 = vsel %vm2629_vm7, %v3009_v46, 0.0 }
 0x234   : > { %2677 = vst.msk [vmem:[%s5316_s18 + $0x178] sm:$0xff] %vm2629_vm7, %v2628_v7  ;;  %v3246_v56 = vsel %vm2629_vm7, %v3158_v51, 0.0  ;;  %v3248_v32 = vsel %vm2629_vm7, %v3159_v58, 0.0  ;;  %v3100_v40 = vsel %vm2629_vm7, %v3010_v0, 0.0  ;;  %v3013_v26 = vmul.f32 %v2960_v43, %v2627_v61 }
 0x235   : > { %v2626_v18 = vadd.f32 %v4089_v11, %v2571_v10  ;;  %v3099_v37 = vadd.f32 %v3098_v15, %v3097_v16  ;;  %v3247_v63 = vadd.f32 %v3246_v56, %v3245_v44  ;;  %v3161_v39 = vmul.f32 %v3011_v50, %v3011_v50 }
 0x236   : > { %v3250_v62 = vsel %vm2629_vm7, %v3160_v2, 0.0  ;;  %v3102_v24 = vsel %vm2629_vm7, %v3011_v50, 0.0  ;;  %v3014_v6 = vmul.f32 %v2965_v30, %v2628_v7  ;;  %v3163_v53 = vmul.f32 %v3013_v26, %v3013_v26 }
 0x237   : > { %2675 = vst.msk [vmem:[%s5316_s18 + $0x168] sm:$0xff] %vm2629_vm7, %v2626_v18  ;;  %v3012_v38 = vmul.f32 %v2955_v4, %v2626_v18  ;;  %v3249_v42 = vadd.f32 %v3248_v32, %v3247_v63  ;;  %v3101_v21 = vadd.f32 %v3100_v40, %v3099_v37  ;;  %v3252_v22 = vsel %vm2629_vm7, %v3161_v39, 0.0  ;;  %s3295_s18 = scalar_lea.sflag [#allocation4], %s5692_s20 }
 0x238   : > { %v3106_v41 = vsel %vm2629_vm7, %v3013_v26, 0.0  ;;  %v3164_v34 = vmul.f32 %v3014_v6, %v3014_v6  ;;  %v3256_v35 = vsel %vm2629_vm7, %v3163_v53, 0.0  ;;  %v3108_v47 = vsel %vm2629_vm7, %v3014_v6, 0.0 }
 0x239   : > { %v3104_v23 = vsel %vm2629_vm7, %v3012_v38, 0.0  ;;  %v3162_v60 = vmul.f32 %v3012_v38, %v3012_v38  ;;  %v3103_v9 = vadd.f32 %v3102_v24, %v3101_v21  ;;  %v3251_v33 = vadd.f32 %v3250_v62, %v3249_v42 }
 0x23a   : > { %v3258_v46 = vsel %vm2629_vm7, %v3164_v34, 0.0 }
 0x23b   : > { %v3254_v11 = vsel %vm2629_vm7, %v3162_v60, 0.0  ;;  %v3253_v29 = vadd.f32 %v3252_v22, %v3251_v33  ;;  %v3105_v31 = vadd.f32 %v3104_v23, %v3103_v9 }
 0x23d   : > { %v3107_v14 = vadd.f32 %v3106_v41, %v3105_v31  ;;  %v3255_v45 = vadd.f32 %v3254_v11, %v3253_v29 }
 0x23f   : > { %v3109_v17 = vadd.f32 %v3108_v47, %v3107_v14  ;;  %v3257_v52 = vadd.f32 %v3256_v35, %v3255_v45 }
 0x241   : > { %v3110_v1 = vrot.slane %v3109_v17, 4  ;;  %v3259_v3 = vadd.f32 %v3258_v46, %v3257_v52 }
 0x243   : > { %v3111_v12 = vadd.f32 %v3110_v1, %v3109_v17  ;;  %v3260_v55 = vrot.slane %v3259_v3, 4 }
 0x245   : > { %v3112_v20 = vrot.slane %v3111_v12, 2  ;;  %v3261_v28 = vadd.f32 %v3260_v55, %v3259_v3 }
 0x247   : > { %v3113_v13 = vadd.f32 %v3112_v20, %v3111_v12  ;;  %v3262_v27 = vrot.slane %v3261_v28, 2 }
 0x249   : > { %v3114_v8 = vrot.slane %v3113_v13, 1  ;;  %v3263_v36 = vadd.f32 %v3262_v27, %v3261_v28 }
 0x24b   : > { %v3115_v0 = vadd.f32 %v3114_v8, %v3113_v13  ;;  %v3264_v61 = vrot.slane %v3263_v36, 1 }
 0x24d   : > { %3272 = vst.msk [vmem:[%s272_s16] sm:$0x1] %vm3271_vm8, %v3115_v0  ;;  %v3265_v19 = vadd.f32 %v3264_v61, %v3263_v36 }
 0x24e   : > { %4103 = shalt.err (!%p4100_p5)
}
 0x24f   : > { %s4104_s27 = scalar_lea.hbm %s5702_s12, 16  ;;  %s4108_s13 = scalar_lea.hbm %s5786_s5, 32 }
 0x250   : > { %p4105_p6 = scmp.ne.s32.totalorder %s5702_s12, %s4104_s27  ;;  %p4109_p10 = scmp.lt.s32.totalorder %s5702_s12, %s5786_s5 }
 0x251   : > { %p4110_p11 = scmp.lt.s32.totalorder %s4108_s13, %s4104_s27 }
 0x252   : > { %p4106_p7 = pnand %p4105_p6, %p4278_p4 }
 0x253   : > { %p4111_p12 = por %p4110_p11, %p4109_p10 }
 0x254   : > { %p4107_p9 = pneg %p4106_p7 }
 0x256   : > { %p4112_p13 = pnand %p4111_p12, %p4107_p9 }
 0x258   : > { %4115 = shalt.err (!%p4112_p13)
}
 0x259   : > { %3938 = dma.vmem_to_hbm [thread:$0]  (%p4278_p4), %s5704_s17, 16, %s5702_s12, %s3295_s18  }
 0x25a   : > { %s5827_s11 = scalar_lea.vmem [#allocation5], %s5692_s20  ;;  %s3299_s28 = scalar_lea.sflag [#allocation6], %s5692_s20 }
 0x25b   : > { %3273 = vst.msk [vmem:[%s5827_s11] sm:$0x1] %vm3271_vm8, %v3265_v19  ;;  %s4116_s15 = scalar_lea.vmem %s5712_s30, 16  ;;  %s4202_s8 = smov [#allocation5]  }
 0x25c   : > { %p4117_p0 = scmp.ne.s32.totalorder %s5712_s30, %s4116_s15  ;;  %s4120_s27 = sshll.u32 %s4202_s8, 4  ;;  %s4121_s27 = int_to_ptr.vmem [resolvable:$false] %s4120_s27 }
 0x25d   : > { %s4122_s16 = scalar_lea.vmem %s4121_s27, 32  ;;  %p4123_p3 = scmp.lt.s32.totalorder %s5712_s30, %s4121_s27 }
 0x25e   : > { %p4118_p1 = pnand %p4117_p0, %p4278_p4  ;;  %p4124_p5 = scmp.lt.s32.totalorder %s4122_s16, %s4116_s15 }
 0x260   : > { %p4119_p2 = pneg %p4118_p1  ;;  %p4125_p6 = por %p4124_p5, %p4123_p3 }
 0x262   : > { %p4126_p7 = pnand %p4125_p6, %p4119_p2 }
 0x264   : > { %4129 = shalt.err (!%p4126_p7)
}
 0x265   : > { %s4130_s17 = scalar_lea.hbm %s5710_s14, 16  ;;  %s4134_s18 = scalar_lea.hbm %s5787_s6, 32 }
 0x266   : > { %p4131_p9 = scmp.ne.s32.totalorder %s5710_s14, %s4130_s17  ;;  %p4135_p12 = scmp.lt.s32.totalorder %s5710_s14, %s5787_s6 }
 0x267   : > { %p4136_p13 = scmp.lt.s32.totalorder %s4134_s18, %s4130_s17 }
 0x268   : > { %p4132_p10 = pnand %p4131_p9, %p4278_p4 }
 0x269   : > { %p4137_p0 = por %p4136_p13, %p4135_p12 }
 0x26a   : > { %p4133_p11 = pneg %p4132_p10 }
 0x26c   : > { %p4138_p1 = pnand %p4137_p0, %p4133_p11 }
 0x26e   : > { %4141 = shalt.err (!%p4138_p1)
}
 0x26f   : > { %3939 = dma.vmem_to_hbm [thread:$0]  (%p4278_p4), %s5712_s30, 16, %s5710_s14, %s3299_s28  }
 0x270 PF: > { %p3949_p2 = scmp.ge.s32.totalorder %s4196_s26, 2  ;;  %s3352_s19 = sand.u32 1, %s4176_s21  }
 0x271   : > { %s3353_s11 = scalar_lea.sflag [#allocation4], %s3352_s19 }
 0x272   : > { %p3943_p3 = pnand %p3949_p2, %p4285_p8 }
 0x274   : > { %p3944_p5 = pneg %p3943_p3 }
 0x276   : > { %4167 = dma.done.wait (%p3944_p5), %s3353_s11, 16  }
 0x277   : > { %4169 = vsyncadd (%p3944_p5), %s3353_s11, 4294967280  ;;  %s3361_s15 = scalar_lea.sflag [#allocation6], %s3352_s19 }
 0x278   : > { %4171 = dma.done.wait (%p3944_p5), %s3361_s15, 16  }
 0x279   : > { %4173 = vsyncadd (%p3944_p5), %s3361_s15, 4294967280  ;;  %s23_s26 = sadd.s32 1, %s4196_s26   ;;  %s5828_s21 = smov %s4180_s22 }
 0x27a   : > { %p20_p6 = scmp.ge.s32.totalorder %s23_s26, 4   ;;  %s5829_s22 = smov %s4184_s23 }
 0x27b   : > { %s5830_s23 = smov %s4291_s10  ;;  %s5831_s24 = smov %s4192_s25 }
 0x27c   : > { %s5832_s25 = smov %s5834_s29  ;;  %22 = sbr.rel (!%p20_p6) target bundleno = 6 (0x6), region = 112 }
 0x281   :  { %3365 = vsyncpa [#allocation4], 1 }
 0x282   :  { %3367 = vsyncpa [#allocation4 + $0x1], 1 }
 0x283   :  { %3368 = vsyncpa [#allocation6], 1 }
 0x284   :  { %3370 = vsyncpa [#allocation6 + $0x1], 1 }

</bundles_post_ra>
